<compile_context>
chip_gen: v6e
topology: v6e:2x2x1
jax: 0.10.0
libtpu: 0.0.40
codegen_flags: <defaults>
</compile_context>

<pallas_src>
import functools
import math

import jax
import jax.numpy as jnp
from jax.experimental import pallas as pl
from jax.experimental.pallas import tpu as pltpu


def _mha_kernel(q_ref, k_ref, v_ref,
                wq_ref, bq_ref, wk_ref, bk_ref, wv_ref, bv_ref,
                wm_ref, bm_ref,
                o_ref,
                x_ref,
                *, num_heads, head_dim, n_real):
    """One (batch, query-tile) grid step.

    q_ref : (1, D, TQ) bf16   query activations (channels-first)
    k_ref : (1, D, NP) bf16   full padded key activations
    v_ref : (1, D, NP) bf16   full padded value activations
    w*_ref: (D, D)     bf16   head-permuted 1x1-conv weights (scale folded into wq)
    b*_ref: (D, 1)     f32    head-permuted biases (scale folded into bq)
    o_ref : (1, D, TQ) f32    output tile
    x_ref : (D, TQ)    f32    VMEM scratch holding the per-head outputs
    """
    q = q_ref[0]   # (D, TQ) bf16
    k = k_ref[0]   # (D, NP) bf16
    v = v_ref[0]

    # 1x1 Conv1d projections: bf16 MXU operands, f32 accumulation, f32 bias.
    qp = jnp.dot(wq_ref[...], q, preferred_element_type=jnp.float32) + bq_ref[...]
    kp = jnp.dot(wk_ref[...], k, preferred_element_type=jnp.float32) + bk_ref[...]
    vp = jnp.dot(wv_ref[...], v, preferred_element_type=jnp.float32) + bv_ref[...]

    np_ = kp.shape[1]
    key_valid = None
    if n_real < np_:  # static: only mask when the sequence was padded
        key_valid = jax.lax.broadcasted_iota(jnp.int32, (1, np_), 1) < n_real

    for h in range(num_heads):  # static unroll; 8-row-aligned f32 slices (free views)
        sl = slice(h * head_dim, (h + 1) * head_dim)
        qh = qp[sl, :].astype(jnp.bfloat16)   # (hd, TQ)
        kh = kp[sl, :].astype(jnp.bfloat16)   # (hd, NP)
        vh = vp[sl, :].astype(jnp.bfloat16)   # (hd, NP)

        # scores[n, m] = sum_d qh[d, n] * kh[d, m]  (1/sqrt(hd) already folded in)
        scores = jax.lax.dot_general(
            qh, kh, (((0,), (0,)), ((), ())),
            preferred_element_type=jnp.float32)          # (TQ, NP) f32
        if key_valid is not None:
            scores = jnp.where(key_valid, scores, -1e30)

        # f32 softmax over keys; divide -> EUP approx-reciprocal multiply.
        m = jnp.max(scores, axis=-1, keepdims=True)
        p = jnp.exp(scores - m)
        l = jnp.sum(p, axis=-1, keepdims=True)
        p = (p * pl.reciprocal(l, approx=True)).astype(jnp.bfloat16)

        # oh[d, n] = sum_m vh[d, m] * p[n, m]
        oh = jax.lax.dot_general(
            vh, p, (((1,), (1,)), ((), ())),
            preferred_element_type=jnp.float32)          # (hd, TQ) f32
        x_ref[sl, :] = oh

    # Merge 1x1 Conv1d: single D-deep MXU matmul over head-permuted channels.
    x = x_ref[...].astype(jnp.bfloat16)
    o = jnp.dot(wm_ref[...], x, preferred_element_type=jnp.float32) + bm_ref[...]
    o_ref[0] = o.astype(o_ref.dtype)


def _head_perm(d_model, num_heads):
    head_dim = d_model // num_heads
    # PyTorch view(B, head_dim, num_heads, N): original channel c = d*num_heads + h.
    # Permuted order groups each head contiguously: p = h*head_dim + d.
    perm = [d * num_heads + h for h in range(num_heads) for d in range(head_dim)]
    return jnp.asarray(perm, dtype=jnp.int32)


def _pick_query_tile(n_pad, max_tile):
    # Largest multiple of 128 that divides n_pad and is <= max_tile.
    best, t = 128, 128
    while t <= min(n_pad, max_tile):
        if n_pad % t == 0:
            best = t
        t += 128
    return best


def multi_headed_attention(q, k, v, params, num_heads, *, max_query_tile=512):
    B, D, N = q.shape
    assert D % num_heads == 0
    head_dim = D // num_heads
    perm = _head_perm(D, num_heads)
    scale = 1.0 / math.sqrt(head_dim)

    # Lane-dense padding of the sequence axis; padded keys are masked in-kernel,
    # padded query columns are sliced off below.
    n_pad = max(128, ((N + 127) // 128) * 128)
    tq = _pick_query_tile(n_pad, max_query_tile)
    n_qt = n_pad // tq

    def pad_seq(x):
        if n_pad != N:
            x = jnp.pad(x, ((0, 0), (0, 0), (0, n_pad - N)))
        return x.astype(jnp.bfloat16)

    q_in, k_in, v_in = pad_seq(q), pad_seq(k), pad_seq(v)

    # Head-permute projection rows / merge columns; fold 1/sqrt(head_dim) into
    # the query projection (scale in f32 before the bf16 cast).
    wq = (params["wq"][perm, :] * scale).astype(jnp.bfloat16)
    wk = params["wk"][perm, :].astype(jnp.bfloat16)
    wv = params["wv"][perm, :].astype(jnp.bfloat16)
    bq = (params["bq"][perm] * scale).reshape(D, 1).astype(jnp.float32)
    bk = params["bk"][perm].reshape(D, 1).astype(jnp.float32)
    bv = params["bv"][perm].reshape(D, 1).astype(jnp.float32)
    wm = params["wm"][:, perm].astype(jnp.bfloat16)
    bm = params["bm"].reshape(D, 1).astype(jnp.float32)

    kernel = functools.partial(_mha_kernel, num_heads=num_heads,
                               head_dim=head_dim, n_real=N)

    q_spec = pl.BlockSpec((1, D, tq), lambda b, t: (b, 0, t))
    kv_spec = pl.BlockSpec((1, D, n_pad), lambda b, t: (b, 0, 0))
    w_spec = pl.BlockSpec((D, D), lambda b, t: (0, 0))
    b_spec = pl.BlockSpec((D, 1), lambda b, t: (0, 0))

    out = pl.pallas_call(
        kernel,
        out_shape=jax.ShapeDtypeStruct((B, D, n_pad), jnp.float32),
        grid=(B, n_qt),
        in_specs=[q_spec, kv_spec, kv_spec,
                  w_spec, b_spec, w_spec, b_spec, w_spec, b_spec,
                  w_spec, b_spec],
        out_specs=q_spec,
        scratch_shapes=[pltpu.VMEM((D, tq), jnp.float32)],
        compiler_params=pltpu.CompilerParams(
            dimension_semantics=("parallel", "parallel"),
            vmem_limit_bytes=48 * 1024 * 1024),
    )(q_in, k_in, v_in, wq, bq, wk, bk, wv, bv, wm, bm)

    if n_pad != N:
        out = out[:, :, :N]
    return out


def reference_forward(q, k, v, params, num_heads):
    """Pure-JAX f32 reference matching the PyTorch module semantics."""
    B, D, N = q.shape
    head_dim = D // num_heads
    hp = jax.lax.Precision.HIGHEST

    def proj(x, w, b):
        return jnp.einsum("oi,bin->bon", w, x, precision=hp) + b.reshape(1, D, 1)

    qp = proj(q, params["wq"], params["bq"]).reshape(B, head_dim, num_heads, N)
    kp = proj(k, params["wk"], params["bk"]).reshape(B, head_dim, num_heads, N)
    vp = proj(v, params["wv"], params["bv"]).reshape(B, head_dim, num_heads, N)

    scores = jnp.einsum("bdhn,bdhm->bhnm", qp, kp, precision=hp) / math.sqrt(head_dim)
    prob = jax.nn.softmax(scores, axis=-1)
    x = jnp.einsum("bhnm,bdhm->bdhn", prob, vp, precision=hp).reshape(B, D, N)
    return jnp.einsum("oi,bin->bon", params["wm"], x, precision=hp) + params["bm"].reshape(1, D, 1)


if __name__ == "__main__":
    B, d_model, num_heads, N = 2, 32, 4, 16

    key = jax.random.PRNGKey(0)
    ks = jax.random.split(key, 11)

    def w_init(k):
        return jax.random.normal(k, (d_model, d_model), jnp.float32) * 0.1

    def b_init(k):
        return jax.random.normal(k, (d_model,), jnp.float32) * 0.05

    params = {
        "wq": w_init(ks[0]), "bq": b_init(ks[1]),
        "wk": w_init(ks[2]), "bk": b_init(ks[3]),
        "wv": w_init(ks[4]), "bv": b_init(ks[5]),
        "wm": w_init(ks[6]), "bm": b_init(ks[7]),
    }

    q = jax.random.normal(ks[8], (B, d_model, N), jnp.float32)
    k = jax.random.normal(ks[9], (B, d_model, N), jnp.float32)
    v = jax.random.normal(ks[10], (B, d_model, N), jnp.float32)

    out = multi_headed_attention(q, k, v, params, num_heads)
    out = jax.block_until_ready(out)

    ref = reference_forward(q, k, v, params, num_heads)
    assert out.shape == (B, d_model, N)
    max_err = jnp.max(jnp.abs(out - ref))
    # bf16 MXU operands + approx reciprocal -> loosened tolerance vs f32 reference.
    assert jnp.allclose(out, ref, atol=2e-2, rtol=2e-2), f"max err {max_err}"

    print("KERNEL_OK")
</pallas_src>

<mosaic_0001>
module attributes {stable_mosaic.version = 11 : i64} {
  func.func @_mha_kernel(%arg0: i32, %arg1: i32, %arg2: memref<1x32x128xbf16, #tpu.memory_space<vmem>>, %arg3: memref<1x32x128xbf16, #tpu.memory_space<vmem>>, %arg4: memref<1x32x128xbf16, #tpu.memory_space<vmem>>, %arg5: memref<32x32xbf16, #tpu.memory_space<vmem>>, %arg6: memref<32x1xf32, #tpu.memory_space<vmem>>, %arg7: memref<32x32xbf16, #tpu.memory_space<vmem>>, %arg8: memref<32x1xf32, #tpu.memory_space<vmem>>, %arg9: memref<32x32xbf16, #tpu.memory_space<vmem>>, %arg10: memref<32x1xf32, #tpu.memory_space<vmem>>, %arg11: memref<32x32xbf16, #tpu.memory_space<vmem>>, %arg12: memref<32x1xf32, #tpu.memory_space<vmem>>, %arg13: memref<1x32x128xf32, #tpu.memory_space<vmem>>, %arg14: memref<32x128xf32, #tpu.memory_space<vmem>>) attributes {dimension_semantics = [#tpu.dimension_semantics<parallel>, #tpu.dimension_semantics<parallel>], iteration_bounds = array<i64: 2, 1>, scalar_prefetch = 0 : i64, scratch_operands = 1 : i64, tpu.core_type = #tpu.core_type<tc>, window_params = [{transform_indices = @transform_0, window_bounds = array<i64: 1, 32, 128>}, {transform_indices = @transform_1, window_bounds = array<i64: 1, 32, 128>}, {transform_indices = @transform_2, window_bounds = array<i64: 1, 32, 128>}, {pipeline_mode = #tpu.pipeline_mode<synchronous>, transform_indices = @transform_3, window_bounds = array<i64: 32, 32>}, {pipeline_mode = #tpu.pipeline_mode<synchronous>, transform_indices = @transform_4, window_bounds = array<i64: 32, 1>}, {pipeline_mode = #tpu.pipeline_mode<synchronous>, transform_indices = @transform_5, window_bounds = array<i64: 32, 32>}, {pipeline_mode = #tpu.pipeline_mode<synchronous>, transform_indices = @transform_6, window_bounds = array<i64: 32, 1>}, {pipeline_mode = #tpu.pipeline_mode<synchronous>, transform_indices = @transform_7, window_bounds = array<i64: 32, 32>}, {pipeline_mode = #tpu.pipeline_mode<synchronous>, transform_indices = @transform_8, window_bounds = array<i64: 32, 1>}, {pipeline_mode = #tpu.pipeline_mode<synchronous>, transform_indices = @transform_9, window_bounds = array<i64: 32, 32>}, {pipeline_mode = #tpu.pipeline_mode<synchronous>, transform_indices = @transform_10, window_bounds = array<i64: 32, 1>}, {transform_indices = @transform_11, window_bounds = array<i64: 1, 32, 128>}]} {
    %c0 = arith.constant 0 : index
    %c0_0 = arith.constant 0 : index
    %c0_1 = arith.constant 0 : index
    %0 = vector.load %arg2[%c0, %c0_0, %c0_1] : memref<1x32x128xbf16, #tpu.memory_space<vmem>>, vector<1x32x128xbf16>
    %1 = vector.shape_cast %0 : vector<1x32x128xbf16> to vector<32x128xbf16>
    %c0_2 = arith.constant 0 : index
    %c0_3 = arith.constant 0 : index
    %c0_4 = arith.constant 0 : index
    %2 = vector.load %arg3[%c0_2, %c0_3, %c0_4] : memref<1x32x128xbf16, #tpu.memory_space<vmem>>, vector<1x32x128xbf16>
    %3 = vector.shape_cast %2 : vector<1x32x128xbf16> to vector<32x128xbf16>
    %c0_5 = arith.constant 0 : index
    %c0_6 = arith.constant 0 : index
    %c0_7 = arith.constant 0 : index
    %4 = vector.load %arg4[%c0_5, %c0_6, %c0_7] : memref<1x32x128xbf16, #tpu.memory_space<vmem>>, vector<1x32x128xbf16>
    %5 = vector.shape_cast %4 : vector<1x32x128xbf16> to vector<32x128xbf16>
    %c0_8 = arith.constant 0 : index
    %c0_9 = arith.constant 0 : index
    %6 = vector.load %arg5[%c0_8, %c0_9] : memref<32x32xbf16, #tpu.memory_space<vmem>>, vector<32x32xbf16>
    %cst = arith.constant dense<0.000000e+00> : vector<32x128xf32>
    %7 = tpu.matmul %6, %1, %cst {dimension_numbers = #tpu.dot_dimension_numbers<[1], [0], [0], [1], [0, 0, 1, 1], [], []>} : vector<32x32xbf16>, vector<32x128xbf16>, vector<32x128xf32> -> vector<32x128xf32>
    %c0_10 = arith.constant 0 : index
    %c0_11 = arith.constant 0 : index
    %8 = vector.load %arg6[%c0_10, %c0_11] : memref<32x1xf32, #tpu.memory_space<vmem>>, vector<32x1xf32>
    %9 = vector.broadcast %8 : vector<32x1xf32> to vector<32x128xf32>
    %10 = arith.addf %7, %9 : vector<32x128xf32>
    %c0_12 = arith.constant 0 : index
    %c0_13 = arith.constant 0 : index
    %11 = vector.load %arg7[%c0_12, %c0_13] : memref<32x32xbf16, #tpu.memory_space<vmem>>, vector<32x32xbf16>
    %cst_14 = arith.constant dense<0.000000e+00> : vector<32x128xf32>
    %12 = tpu.matmul %11, %3, %cst_14 {dimension_numbers = #tpu.dot_dimension_numbers<[1], [0], [0], [1], [0, 0, 1, 1], [], []>} : vector<32x32xbf16>, vector<32x128xbf16>, vector<32x128xf32> -> vector<32x128xf32>
    %c0_15 = arith.constant 0 : index
    %c0_16 = arith.constant 0 : index
    %13 = vector.load %arg8[%c0_15, %c0_16] : memref<32x1xf32, #tpu.memory_space<vmem>>, vector<32x1xf32>
    %14 = vector.broadcast %13 : vector<32x1xf32> to vector<32x128xf32>
    %15 = arith.addf %12, %14 : vector<32x128xf32>
    %c0_17 = arith.constant 0 : index
    %c0_18 = arith.constant 0 : index
    %16 = vector.load %arg9[%c0_17, %c0_18] : memref<32x32xbf16, #tpu.memory_space<vmem>>, vector<32x32xbf16>
    %cst_19 = arith.constant dense<0.000000e+00> : vector<32x128xf32>
    %17 = tpu.matmul %16, %5, %cst_19 {dimension_numbers = #tpu.dot_dimension_numbers<[1], [0], [0], [1], [0, 0, 1, 1], [], []>} : vector<32x32xbf16>, vector<32x128xbf16>, vector<32x128xf32> -> vector<32x128xf32>
    %c0_20 = arith.constant 0 : index
    %c0_21 = arith.constant 0 : index
    %18 = vector.load %arg10[%c0_20, %c0_21] : memref<32x1xf32, #tpu.memory_space<vmem>>, vector<32x1xf32>
    %19 = vector.broadcast %18 : vector<32x1xf32> to vector<32x128xf32>
    %20 = arith.addf %17, %19 : vector<32x128xf32>
    %21 = tpu.iota {dimensions = array<i32: 1>} : vector<1x128xi32>
    %c16_i32 = arith.constant 16 : i32
    %22 = vector.broadcast %c16_i32 : i32 to vector<1x128xi32>
    %23 = arith.cmpi slt, %21, %22 : vector<1x128xi32>
    %24 = vector.extract_strided_slice %10 {offsets = [0, 0], sizes = [8, 128], strides = [1, 1]} : vector<32x128xf32> to vector<8x128xf32>
    %25 = arith.truncf %24 : vector<8x128xf32> to vector<8x128xbf16>
    %26 = vector.extract_strided_slice %15 {offsets = [0, 0], sizes = [8, 128], strides = [1, 1]} : vector<32x128xf32> to vector<8x128xf32>
    %27 = arith.truncf %26 : vector<8x128xf32> to vector<8x128xbf16>
    %28 = vector.extract_strided_slice %20 {offsets = [0, 0], sizes = [8, 128], strides = [1, 1]} : vector<32x128xf32> to vector<8x128xf32>
    %29 = arith.truncf %28 : vector<8x128xf32> to vector<8x128xbf16>
    %cst_22 = arith.constant dense<0.000000e+00> : vector<128x128xf32>
    %30 = tpu.matmul %25, %27, %cst_22 {dimension_numbers = #tpu.dot_dimension_numbers<[0], [0], [1], [1], [0, 1, 1, 1], [], []>} : vector<8x128xbf16>, vector<8x128xbf16>, vector<128x128xf32> -> vector<128x128xf32>
    %cst_23 = arith.constant -1.000000e+30 : f32
    %31 = vector.shape_cast %23 : vector<1x128xi1> to vector<1x128xi1>
    %32 = vector.broadcast %31 : vector<1x128xi1> to vector<128x128xi1>
    %33 = vector.broadcast %cst_23 : f32 to vector<128x128xf32>
    %34 = arith.select %32, %30, %33 : vector<128x128xi1>, vector<128x128xf32>
    %cst_24 = arith.constant dense<0xFF800000> : vector<128xf32>
    %35 = vector.multi_reduction <maximumf>, %34, %cst_24 [1] : vector<128x128xf32> to vector<128xf32>
    %36 = vector.shape_cast %35 : vector<128xf32> to vector<128x1xf32>
    %37 = vector.broadcast %36 : vector<128x1xf32> to vector<128x128xf32>
    %38 = arith.subf %34, %37 : vector<128x128xf32>
    %39 = math.exp %38 : vector<128x128xf32>
    %cst_25 = arith.constant dense<0.000000e+00> : vector<128xf32>
    %40 = vector.multi_reduction <add>, %39, %cst_25 [1] : vector<128x128xf32> to vector<128xf32>
    %41 = vector.shape_cast %40 : vector<128xf32> to vector<128x1xf32>
    %42 = tpu.reciprocal %41 {approx = true} : vector<128x1xf32> -> vector<128x1xf32>
    %43 = vector.broadcast %42 : vector<128x1xf32> to vector<128x128xf32>
    %44 = arith.mulf %39, %43 : vector<128x128xf32>
    %45 = arith.truncf %44 : vector<128x128xf32> to vector<128x128xbf16>
    %cst_26 = arith.constant dense<0.000000e+00> : vector<8x128xf32>
    %46 = tpu.matmul %29, %45, %cst_26 {dimension_numbers = #tpu.dot_dimension_numbers<[1], [1], [0], [0], [0, 0, 1, 0], [], []>} : vector<8x128xbf16>, vector<128x128xbf16>, vector<8x128xf32> -> vector<8x128xf32>
    %c0_27 = arith.constant 0 : index
    %c0_28 = arith.constant 0 : index
    %47 = vector.load %arg14[%c0_27, %c0_28] : memref<32x128xf32, #tpu.memory_space<vmem>>, vector<8x128xf32>
    tpu.vector_store %arg14[%c0_27, %c0_28], %46 {strides = array<i32>} : memref<32x128xf32, #tpu.memory_space<vmem>>, vector<8x128xf32>,
    %48 = vector.extract_strided_slice %10 {offsets = [8, 0], sizes = [8, 128], strides = [1, 1]} : vector<32x128xf32> to vector<8x128xf32>
    %49 = arith.truncf %48 : vector<8x128xf32> to vector<8x128xbf16>
    %50 = vector.extract_strided_slice %15 {offsets = [8, 0], sizes = [8, 128], strides = [1, 1]} : vector<32x128xf32> to vector<8x128xf32>
    %51 = arith.truncf %50 : vector<8x128xf32> to vector<8x128xbf16>
    %52 = vector.extract_strided_slice %20 {offsets = [8, 0], sizes = [8, 128], strides = [1, 1]} : vector<32x128xf32> to vector<8x128xf32>
    %53 = arith.truncf %52 : vector<8x128xf32> to vector<8x128xbf16>
    %cst_29 = arith.constant dense<0.000000e+00> : vector<128x128xf32>
    %54 = tpu.matmul %49, %51, %cst_29 {dimension_numbers = #tpu.dot_dimension_numbers<[0], [0], [1], [1], [0, 1, 1, 1], [], []>} : vector<8x128xbf16>, vector<8x128xbf16>, vector<128x128xf32> -> vector<128x128xf32>
    %cst_30 = arith.constant -1.000000e+30 : f32
    %55 = vector.shape_cast %23 : vector<1x128xi1> to vector<1x128xi1>
    %56 = vector.broadcast %55 : vector<1x128xi1> to vector<128x128xi1>
    %57 = vector.broadcast %cst_30 : f32 to vector<128x128xf32>
    %58 = arith.select %56, %54, %57 : vector<128x128xi1>, vector<128x128xf32>
    %cst_31 = arith.constant dense<0xFF800000> : vector<128xf32>
    %59 = vector.multi_reduction <maximumf>, %58, %cst_31 [1] : vector<128x128xf32> to vector<128xf32>
    %60 = vector.shape_cast %59 : vector<128xf32> to vector<128x1xf32>
    %61 = vector.broadcast %60 : vector<128x1xf32> to vector<128x128xf32>
    %62 = arith.subf %58, %61 : vector<128x128xf32>
    %63 = math.exp %62 : vector<128x128xf32>
    %cst_32 = arith.constant dense<0.000000e+00> : vector<128xf32>
    %64 = vector.multi_reduction <add>, %63, %cst_32 [1] : vector<128x128xf32> to vector<128xf32>
    %65 = vector.shape_cast %64 : vector<128xf32> to vector<128x1xf32>
    %66 = tpu.reciprocal %65 {approx = true} : vector<128x1xf32> -> vector<128x1xf32>
    %67 = vector.broadcast %66 : vector<128x1xf32> to vector<128x128xf32>
    %68 = arith.mulf %63, %67 : vector<128x128xf32>
    %69 = arith.truncf %68 : vector<128x128xf32> to vector<128x128xbf16>
    %cst_33 = arith.constant dense<0.000000e+00> : vector<8x128xf32>
    %70 = tpu.matmul %53, %69, %cst_33 {dimension_numbers = #tpu.dot_dimension_numbers<[1], [1], [0], [0], [0, 0, 1, 0], [], []>} : vector<8x128xbf16>, vector<128x128xbf16>, vector<8x128xf32> -> vector<8x128xf32>
    %c8 = arith.constant 8 : index
    %c0_34 = arith.constant 0 : index
    %71 = vector.load %arg14[%c8, %c0_34] : memref<32x128xf32, #tpu.memory_space<vmem>>, vector<8x128xf32>
    tpu.vector_store %arg14[%c8, %c0_34], %70 {strides = array<i32>} : memref<32x128xf32, #tpu.memory_space<vmem>>, vector<8x128xf32>,
    %72 = vector.extract_strided_slice %10 {offsets = [16, 0], sizes = [8, 128], strides = [1, 1]} : vector<32x128xf32> to vector<8x128xf32>
    %73 = arith.truncf %72 : vector<8x128xf32> to vector<8x128xbf16>
    %74 = vector.extract_strided_slice %15 {offsets = [16, 0], sizes = [8, 128], strides = [1, 1]} : vector<32x128xf32> to vector<8x128xf32>
    %75 = arith.truncf %74 : vector<8x128xf32> to vector<8x128xbf16>
    %76 = vector.extract_strided_slice %20 {offsets = [16, 0], sizes = [8, 128], strides = [1, 1]} : vector<32x128xf32> to vector<8x128xf32>
    %77 = arith.truncf %76 : vector<8x128xf32> to vector<8x128xbf16>
    %cst_35 = arith.constant dense<0.000000e+00> : vector<128x128xf32>
    %78 = tpu.matmul %73, %75, %cst_35 {dimension_numbers = #tpu.dot_dimension_numbers<[0], [0], [1], [1], [0, 1, 1, 1], [], []>} : vector<8x128xbf16>, vector<8x128xbf16>, vector<128x128xf32> -> vector<128x128xf32>
    %cst_36 = arith.constant -1.000000e+30 : f32
    %79 = vector.shape_cast %23 : vector<1x128xi1> to vector<1x128xi1>
    %80 = vector.broadcast %79 : vector<1x128xi1> to vector<128x128xi1>
    %81 = vector.broadcast %cst_36 : f32 to vector<128x128xf32>
    %82 = arith.select %80, %78, %81 : vector<128x128xi1>, vector<128x128xf32>
    %cst_37 = arith.constant dense<0xFF800000> : vector<128xf32>
    %83 = vector.multi_reduction <maximumf>, %82, %cst_37 [1] : vector<128x128xf32> to vector<128xf32>
    %84 = vector.shape_cast %83 : vector<128xf32> to vector<128x1xf32>
    %85 = vector.broadcast %84 : vector<128x1xf32> to vector<128x128xf32>
    %86 = arith.subf %82, %85 : vector<128x128xf32>
    %87 = math.exp %86 : vector<128x128xf32>
    %cst_38 = arith.constant dense<0.000000e+00> : vector<128xf32>
    %88 = vector.multi_reduction <add>, %87, %cst_38 [1] : vector<128x128xf32> to vector<128xf32>
    %89 = vector.shape_cast %88 : vector<128xf32> to vector<128x1xf32>
    %90 = tpu.reciprocal %89 {approx = true} : vector<128x1xf32> -> vector<128x1xf32>
    %91 = vector.broadcast %90 : vector<128x1xf32> to vector<128x128xf32>
    %92 = arith.mulf %87, %91 : vector<128x128xf32>
    %93 = arith.truncf %92 : vector<128x128xf32> to vector<128x128xbf16>
    %cst_39 = arith.constant dense<0.000000e+00> : vector<8x128xf32>
    %94 = tpu.matmul %77, %93, %cst_39 {dimension_numbers = #tpu.dot_dimension_numbers<[1], [1], [0], [0], [0, 0, 1, 0], [], []>} : vector<8x128xbf16>, vector<128x128xbf16>, vector<8x128xf32> -> vector<8x128xf32>
    %c16 = arith.constant 16 : index
    %c0_40 = arith.constant 0 : index
    %95 = vector.load %arg14[%c16, %c0_40] : memref<32x128xf32, #tpu.memory_space<vmem>>, vector<8x128xf32>
    tpu.vector_store %arg14[%c16, %c0_40], %94 {strides = array<i32>} : memref<32x128xf32, #tpu.memory_space<vmem>>, vector<8x128xf32>,
    %96 = vector.extract_strided_slice %10 {offsets = [24, 0], sizes = [8, 128], strides = [1, 1]} : vector<32x128xf32> to vector<8x128xf32>
    %97 = arith.truncf %96 : vector<8x128xf32> to vector<8x128xbf16>
    %98 = vector.extract_strided_slice %15 {offsets = [24, 0], sizes = [8, 128], strides = [1, 1]} : vector<32x128xf32> to vector<8x128xf32>
    %99 = arith.truncf %98 : vector<8x128xf32> to vector<8x128xbf16>
    %100 = vector.extract_strided_slice %20 {offsets = [24, 0], sizes = [8, 128], strides = [1, 1]} : vector<32x128xf32> to vector<8x128xf32>
    %101 = arith.truncf %100 : vector<8x128xf32> to vector<8x128xbf16>
    %cst_41 = arith.constant dense<0.000000e+00> : vector<128x128xf32>
    %102 = tpu.matmul %97, %99, %cst_41 {dimension_numbers = #tpu.dot_dimension_numbers<[0], [0], [1], [1], [0, 1, 1, 1], [], []>} : vector<8x128xbf16>, vector<8x128xbf16>, vector<128x128xf32> -> vector<128x128xf32>
    %cst_42 = arith.constant -1.000000e+30 : f32
    %103 = vector.shape_cast %23 : vector<1x128xi1> to vector<1x128xi1>
    %104 = vector.broadcast %103 : vector<1x128xi1> to vector<128x128xi1>
    %105 = vector.broadcast %cst_42 : f32 to vector<128x128xf32>
    %106 = arith.select %104, %102, %105 : vector<128x128xi1>, vector<128x128xf32>
    %cst_43 = arith.constant dense<0xFF800000> : vector<128xf32>
    %107 = vector.multi_reduction <maximumf>, %106, %cst_43 [1] : vector<128x128xf32> to vector<128xf32>
    %108 = vector.shape_cast %107 : vector<128xf32> to vector<128x1xf32>
    %109 = vector.broadcast %108 : vector<128x1xf32> to vector<128x128xf32>
    %110 = arith.subf %106, %109 : vector<128x128xf32>
    %111 = math.exp %110 : vector<128x128xf32>
    %cst_44 = arith.constant dense<0.000000e+00> : vector<128xf32>
    %112 = vector.multi_reduction <add>, %111, %cst_44 [1] : vector<128x128xf32> to vector<128xf32>
    %113 = vector.shape_cast %112 : vector<128xf32> to vector<128x1xf32>
    %114 = tpu.reciprocal %113 {approx = true} : vector<128x1xf32> -> vector<128x1xf32>
    %115 = vector.broadcast %114 : vector<128x1xf32> to vector<128x128xf32>
    %116 = arith.mulf %111, %115 : vector<128x128xf32>
    %117 = arith.truncf %116 : vector<128x128xf32> to vector<128x128xbf16>
    %cst_45 = arith.constant dense<0.000000e+00> : vector<8x128xf32>
    %118 = tpu.matmul %101, %117, %cst_45 {dimension_numbers = #tpu.dot_dimension_numbers<[1], [1], [0], [0], [0, 0, 1, 0], [], []>} : vector<8x128xbf16>, vector<128x128xbf16>, vector<8x128xf32> -> vector<8x128xf32>
    %c24 = arith.constant 24 : index
    %c0_46 = arith.constant 0 : index
    %119 = vector.load %arg14[%c24, %c0_46] : memref<32x128xf32, #tpu.memory_space<vmem>>, vector<8x128xf32>
    tpu.vector_store %arg14[%c24, %c0_46], %118 {strides = array<i32>} : memref<32x128xf32, #tpu.memory_space<vmem>>, vector<8x128xf32>,
    %c0_47 = arith.constant 0 : index
    %c0_48 = arith.constant 0 : index
    %120 = vector.load %arg14[%c0_47, %c0_48] : memref<32x128xf32, #tpu.memory_space<vmem>>, vector<32x128xf32>
    %121 = arith.truncf %120 : vector<32x128xf32> to vector<32x128xbf16>
    %c0_49 = arith.constant 0 : index
    %c0_50 = arith.constant 0 : index
    %122 = vector.load %arg11[%c0_49, %c0_50] : memref<32x32xbf16, #tpu.memory_space<vmem>>, vector<32x32xbf16>
    %cst_51 = arith.constant dense<0.000000e+00> : vector<32x128xf32>
    %123 = tpu.matmul %122, %121, %cst_51 {dimension_numbers = #tpu.dot_dimension_numbers<[1], [0], [0], [1], [0, 0, 1, 1], [], []>} : vector<32x32xbf16>, vector<32x128xbf16>, vector<32x128xf32> -> vector<32x128xf32>
    %c0_52 = arith.constant 0 : index
    %c0_53 = arith.constant 0 : index
    %124 = vector.load %arg12[%c0_52, %c0_53] : memref<32x1xf32, #tpu.memory_space<vmem>>, vector<32x1xf32>
    %125 = vector.broadcast %124 : vector<32x1xf32> to vector<32x128xf32>
    %126 = arith.addf %123, %125 : vector<32x128xf32>
    %c0_54 = arith.constant 0 : index
    %c0_55 = arith.constant 0 : index
    %c0_56 = arith.constant 0 : index
    %127 = vector.load %arg13[%c0_54, %c0_55, %c0_56] : memref<1x32x128xf32, #tpu.memory_space<vmem>>, vector<1x32x128xf32>
    %128 = vector.shape_cast %127 : vector<1x32x128xf32> to vector<32x128xf32>
    %129 = vector.shape_cast %126 : vector<32x128xf32> to vector<1x32x128xf32>
    tpu.vector_store %arg13[%c0_54, %c0_55, %c0_56], %129 {strides = array<i32>} : memref<1x32x128xf32, #tpu.memory_space<vmem>>, vector<1x32x128xf32>,
    return
  }
  func.func @transform_0(%arg0: i32, %arg1: i32) -> (i32, i32, i32) {
    %c0_i32 = arith.constant 0 : i32
    %c0_i32_0 = arith.constant 0 : i32
    return %arg0, %c0_i32, %arg1 : i32, i32, i32
  }
  func.func @transform_1(%arg0: i32, %arg1: i32) -> (i32, i32, i32) {
    %c0_i32 = arith.constant 0 : i32
    %c0_i32_0 = arith.constant 0 : i32
    %c0_i32_1 = arith.constant 0 : i32
    return %arg0, %c0_i32, %c0_i32_0 : i32, i32, i32
  }
  func.func @transform_2(%arg0: i32, %arg1: i32) -> (i32, i32, i32) {
    %c0_i32 = arith.constant 0 : i32
    %c0_i32_0 = arith.constant 0 : i32
    %c0_i32_1 = arith.constant 0 : i32
    return %arg0, %c0_i32, %c0_i32_0 : i32, i32, i32
  }
  func.func @transform_3(%arg0: i32, %arg1: i32) -> (i32, i32) {
    %c0_i32 = arith.constant 0 : i32
    %c0_i32_0 = arith.constant 0 : i32
    %c0_i32_1 = arith.constant 0 : i32
    return %c0_i32, %c0_i32_0 : i32, i32
  }
  func.func @transform_4(%arg0: i32, %arg1: i32) -> (i32, i32) {
    %c0_i32 = arith.constant 0 : i32
    %c0_i32_0 = arith.constant 0 : i32
    %c0_i32_1 = arith.constant 0 : i32
    return %c0_i32, %c0_i32_0 : i32, i32
  }
  func.func @transform_5(%arg0: i32, %arg1: i32) -> (i32, i32) {
    %c0_i32 = arith.constant 0 : i32
    %c0_i32_0 = arith.constant 0 : i32
    %c0_i32_1 = arith.constant 0 : i32
    return %c0_i32, %c0_i32_0 : i32, i32
  }
  func.func @transform_6(%arg0: i32, %arg1: i32) -> (i32, i32) {
    %c0_i32 = arith.constant 0 : i32
    %c0_i32_0 = arith.constant 0 : i32
    %c0_i32_1 = arith.constant 0 : i32
    return %c0_i32, %c0_i32_0 : i32, i32
  }
  func.func @transform_7(%arg0: i32, %arg1: i32) -> (i32, i32) {
    %c0_i32 = arith.constant 0 : i32
    %c0_i32_0 = arith.constant 0 : i32
    %c0_i32_1 = arith.constant 0 : i32
    return %c0_i32, %c0_i32_0 : i32, i32
  }
  func.func @transform_8(%arg0: i32, %arg1: i32) -> (i32, i32) {
    %c0_i32 = arith.constant 0 : i32
    %c0_i32_0 = arith.constant 0 : i32
    %c0_i32_1 = arith.constant 0 : i32
    return %c0_i32, %c0_i32_0 : i32, i32
  }
  func.func @transform_9(%arg0: i32, %arg1: i32) -> (i32, i32) {
    %c0_i32 = arith.constant 0 : i32
    %c0_i32_0 = arith.constant 0 : i32
    %c0_i32_1 = arith.constant 0 : i32
    return %c0_i32, %c0_i32_0 : i32, i32
  }
  func.func @transform_10(%arg0: i32, %arg1: i32) -> (i32, i32) {
    %c0_i32 = arith.constant 0 : i32
    %c0_i32_0 = arith.constant 0 : i32
    %c0_i32_1 = arith.constant 0 : i32
    return %c0_i32, %c0_i32_0 : i32, i32
  }
  func.func @transform_11(%arg0: i32, %arg1: i32) -> (i32, i32, i32) {
    %c0_i32 = arith.constant 0 : i32
    %c0_i32_0 = arith.constant 0 : i32
    return %arg0, %c0_i32, %arg1 : i32, i32, i32
  }
}

</mosaic_0001>

<bundles_post_ra>
// kernel: tpu_custom_call.1
= control target key start
LH: loop header
LB: loop body
LE: loop exit
PB: predicated region body
PF: predicated region fallthrough
CT: control target
= control target key end

     0   :  { %s4412_s0 = inlined_call_operand.vmem [shape: bf16[2,32,128], index: 0, kind: input, shape index: {}]   ;;  %s4413_s1 = inlined_call_operand.vmem [shape: bf16[2,32,128], index: 1, kind: input, shape index: {}]   ;;  %s4414_s2 = inlined_call_operand.vmem [shape: bf16[2,32,128], index: 2, kind: input, shape index: {}]   ;;  %s4415_s3 = inlined_call_operand.vmem [shape: bf16[32,32], index: 3, kind: input, shape index: {}]   ;;  %s4416_s4 = inlined_call_operand.vmem [shape: f32[32,1], index: 4, kind: input, shape index: {}]   ;;  %s4417_s5 = inlined_call_operand.vmem [shape: bf16[32,32], index: 5, kind: input, shape index: {}]   ;;  %s4418_s6 = inlined_call_operand.vmem [shape: f32[32,1], index: 6, kind: input, shape index: {}]   ;;  %s4419_s7 = inlined_call_operand.vmem [shape: bf16[32,32], index: 7, kind: input, shape index: {}]   ;;  %s4420_s8 = inlined_call_operand.vmem [shape: f32[32,1], index: 8, kind: input, shape index: {}]   ;;  %s4421_s9 = inlined_call_operand.hbm [shape: bf16[32,32], index: 9, kind: input, shape index: {}]   ;;  %s4422_s10 = inlined_call_operand.vmem [shape: f32[32,1], index: 10, kind: input, shape index: {}]   ;;  %s4423_s11 = inlined_call_operand.hbm [shape: f32[2,32,128], index: 11, kind: output, shape index: {}]  }
   0x1   :  { %4435 = sst [smem:[#allocation23_spill]] %s4412_s0 }
   0x2   :  { %4436 = sst [smem:[#allocation24_spill]] %s4421_s9 }
   0x3   :  { %16 = vsyncpa [#allocation4], 0 }
   0x4   :  { %17 = vsyncpa [#allocation5], 0 }
   0x5   :  { %19 = vsyncpa [#allocation5 + $0x1], 0  ;;  %s3316_s17 = smov 0   ;;  %s3318_s18 = smov 0  }
   0x6   :  { %s3320_s19 = smov 0   ;;  %s3322_s20 = smov 0  }
   0x7   :  { %s3324_s21 = smov 0   ;;  %s3326_s22 = smov 0  }
   0x8 LB: > { %s2441_s23 = sadd.s32 4294967295, %s3245_s22   ;;  %s2442_s24 = sadd.s32 4294967294, %s3245_s22   ;;  %s3245_s22 = sphi %s3326_s22, %s25_s22   ;;  %s3241_s21 = sphi %s3324_s21, %s4480_s21   ;;  %s3237_s20 = sphi %s3322_s20, %s4479_s20   ;;  %s3233_s19 = sphi %s3320_s19, %s4478_s19   ;;  %s3229_s18 = sphi %s3318_s18, %s4477_s18   ;;  %s3225_s17 = sphi %s3316_s17, %s4476_s17  }
   0x9   : > { %s37_s25 = sadd.s32 1, %s3241_s21  ;;  %s294_s26 = sadd.s32 1, %s3233_s19 }
   0xa   : > { %p39_p0 = scmp.ge.s32.totalorder %s37_s25, 2  ;;  %p304_p1 = scmp.ne.s32.totalorder %s3233_s19, %s3229_s18 }
   0xb   : > { %p305_p2 = scmp.eq.s32.totalorder %s2441_s23, 1  ;;  %p310_p3 = scmp.ne.s32.totalorder %s3229_s18, %s3225_s17 }
   0xc   : > { %s4482_s25 = smov (%p39_p0, %s37_s25), 0  ;;  %p311_p5 = scmp.eq.s32.totalorder %s2442_s24, 1 }
   0xd   : > { %p3356_p4 = por %p305_p2, %p304_p1  ;;  %s289_s28 = ssub.s32 %s3241_s21, %s4482_s25 }
   0xe   : > { %p2443_p6 = scmp.ge.s32.totalorder %s3245_s22, 1  ;;  %p292_p7 = scmp.eq.s32.totalorder %s289_s28, 0 }
   0xf   : > { %p3363_p8 = por %p311_p5, %p310_p3  ;;  %p318_p9 = scmp.lt.s32.totalorder %s3245_s22, 3 }
  0x10   : > { %s3369_s30 = scalar_select %p292_p7, %s3233_s19, %s294_s26  }
  0x11   : > { %p3371_p10 = pnand %p2443_p6, %p318_p9  ;;  %p3375_p11 = scmp.eq.s32.totalorder %s2441_s23, 0 }
  0x12   : > { %s3247_s14 = smov [#allocation3]  }
  0x13   : > { %p2800_p12 = pneg %p3371_p10  ;;  %s348_s15 = sshll.u32 %s3247_s14, 4  ;;  %s349_s15 = int_to_ptr.vmem [resolvable:$true] %s348_s15 }
  0x14   : > { %s3150_s16 = scalar_lea.vmem %s349_s15, 256  ;;  %p3158_p5 = scmp.lt.s32.totalorder %s349_s15, %s349_s15 }
  0x15   : > { %p2801_p13 = pnand %p3375_p11, %p2800_p12  ;;  %p3151_p1 = scmp.ne.s32.totalorder %s349_s15, %s3150_s16 }
  0x16   : > { %p3159_p6 = scmp.lt.s32.totalorder %s3150_s16, %s3150_s16 }
  0x17   : > { %p3141_p0 = pneg %p2801_p13 }
  0x18   : > { %p3160_p7 = por %p3159_p6, %p3158_p5 }
  0x19   : > { %p3153_p2 = pnand %p3151_p1, %p3141_p0 }
  0x1b   : > { %p3154_p3 = pneg %p3153_p2 }
  0x1d   : > { %p3161_p9 = pnand %p3160_p7, %p3154_p3 }
  0x1f   : > { %3164 = shalt.err (!%p3161_p9)
}
  0x20   : > { %s3248_s23 = smov 64   ;;  %s3249_s24 = smov 4  }
  0x21   : > { %s4441_s9 = sld [smem:[#allocation24_spill]] }
  0x23   : > { %394 = sbr.rel (%p3371_p10) target bundleno = 2093 (0x82d), region = 64 }
  0x27   : > { %2803 = dma.hbm_to_vmem [thread:$0]  (!%p2801_p13), %s4441_s9, 256, %s349_s15, [#allocation4], %s3248_s23, %s3248_s23, %s3249_s24  }
  0x28   : > { %3216 = dma.done.wait (%p3375_p11), [#allocation4], 256  }
  0x29   : > { %3218 = vsyncadd (%p3375_p11), [#allocation4], 4294967040  ;;  %p447_p12 = scmp.lt.s32.totalorder %s3237_s20, 1  ;;  %v3250_v0 = vmov 0   ;;  %s4442_s0 = sld [smem:[#allocation23_spill]]  ;;  %vm528_vm0 = vcmask 261120   ;;  %v794_v60 = vlaneseq }
  0x2a   : > { %2867 = vset.pattern.permute.xlu0 %v3250_v0  ;;  %2868 = vset.pattern.permute.xlu1 %v3250_v0  ;;  %v2871_v3 = vld [vmem:[%s4415_s3] sm:$0xff]   ;;  %v2872_v4 = vld [vmem:[%s4415_s3 + $0x8] sm:$0xff]   ;;  %vm841_vm1 = vcmask 1043456   ;;  %vm816_vm2 = vcmask 64512   ;;  %vm3252_vm4 = vmmov 0   ;;  %s444_s26 = sand.u32 1, %s3229_s18  }
  0x2b   : > { %s448_s14 = scalar_select %p447_p12, %s3237_s20, 1  ;;  %2610 = vmatprep.mubr.msk.bf16.mxu1 %vm528_vm0, %v2871_v3  ;;  %v482_v5 = vld [vmem:[%s4416_s4] sm:$0xff]  ;;  %v483_v7 = vld [vmem:[%s4416_s4 + $0x8] sm:$0xff]  ;;  %v3488_v0 = vand.u32 127, %v794_v60 }
  0x2c   : > { %488 = vperm.xlu0 %2867, %v482_v5   ;;  %v2875_v8 = vld [vmem:[%s4417_s5] sm:$0xff]   ;;  %v589_v11 = vld [vmem:[%s4418_s6 + $0x8] sm:$0xff]  ;;  %s2517_s23 = sshll.u32 %s3237_s20, 9  ;;  %s4367_s24 = scalar_lea.sflag [#allocation5], %s444_s26 }
  0x2d   : > { %s3394_s16 = sshll.u32 %s448_s14, 4  ;;  %v588_v10 = vld [vmem:[%s4418_s6] sm:$0xff]  ;;  %v2876_v12 = vld [vmem:[%s4417_s5 + $0x8] sm:$0xff]   ;;  %4451 = vst [vmem:[#allocation17_spill] sm:$0xff] %v3488_v0  ;;  %vm796_vm3 = vcmp.lt.s32.totalorder %v3488_v0, 16  ;;  %s4365_s13 = scalar_lea.hbm %s4423_s11, %s2517_s23 }
  0x2e   : > { %s459_s9 = scalar_lea.vmem %s4413_s1, %s3394_s16  ;;  %594 = vperm.xlu1 %2868, %v588_v10   ;;  %s464_s28 = scalar_lea.vmem %s4414_s2, %s3394_s16  ;;  %v2879_v15 = vld [vmem:[%s4419_s7] sm:$0xff]   ;;  %v2880_v16 = vld [vmem:[%s4419_s7 + $0x8] sm:$0xff]  }
  0x2f   : > { %s454_s12 = scalar_lea.vmem %s4442_s0, %s3394_s16  ;;  %v2873_v6 = vld [vmem:[%s459_s9 + $0x8] sm:$0xff]   ;;  %v2874_v9 = vld [vmem:[%s459_s9] sm:$0xff]   ;;  %2626 = vmatprep.mubr.msk.bf16.mxu0 %vm528_vm0, %v2879_v15  ;;  %s3253_s9 = smov [#allocation6]  }
  0x30   : > { %v2869_v1 = vld [vmem:[%s454_s12 + $0x8] sm:$0xff]   ;;  %v2870_v2 = vld [vmem:[%s454_s12] sm:$0xff]   ;;  %493 = vperm.xlu0 %2867, %v483_v7  }
  0x31   : > { %2606 = vmatprep.subr.bf16.mxu1 %v2869_v1  ;;  %v2877_v13 = vld [vmem:[%s464_s28 + $0x8] sm:$0xff]   ;;  %v2878_v14 = vld [vmem:[%s464_s28] sm:$0xff]   ;;  %s2448_s28 = sshll.u32 %s444_s26, 5 }
  0x32   : > { %2607 = vmatpush3.bf16.msra.mxu1 %v2869_v1  ;;  %599 = vperm.xlu1 %2868, %v589_v11   ;;  %s446_s14 = scalar_lea.vmem [#allocation6], %s2448_s28  ;;  %s3169_s28 = sshll.u32 %s3253_s9, 4  ;;  %s3170_s28 = int_to_ptr.vmem [resolvable:$false] %s3169_s28 }
  0x33   : > { %2608 = vmatprep.subr.bf16.mxu1 %v2870_v2  ;;  %2622 = vmatprep.subr.bf16.mxu0 %v2877_v13  ;;  %s2327_s15 = sshll.u32 %s446_s14, 4  ;;  %s3171_s0 = scalar_lea.vmem %s3170_s28, 1024  ;;  %s4360_s15 = int_to_ptr.vmem [resolvable:$true] %s2327_s15 }
  0x34   : > { %2623 = vmatpush3.bf16.msra.mxu0 %v2877_v13  ;;  %s3165_s20 = scalar_lea.vmem %s4360_s15, 512  ;;  %p3172_p0 = scmp.lt.s32.totalorder %s4360_s15, %s3170_s28 }
  0x35   : > { %2624 = vmatprep.subr.bf16.mxu0 %v2878_v14  ;;  %p3166_p10 = scmp.ne.s32.totalorder %s4360_s15, %s3165_s20  ;;  %p3173_p1 = scmp.lt.s32.totalorder %s3171_s0, %s3165_s20 }
  0x36   : > { %2609 = vmatpush3.bf16.msra.mxu1 %v2870_v2 }
  0x37   : > { %2614 = vmatprep.subr.bf16.mxu1 %v2873_v6  ;;  %p3167_p11 = pnand %p3166_p10, %p3356_p4  ;;  %p3174_p2 = por %p3173_p1, %p3172_p0 }
  0x38   : > { %2625 = vmatpush3.bf16.msra.mxu0 %v2878_v14 }
  0x39   : > { %2611 = vmatmul.mubr.msk.bf16.vlgmr.msra.gmra.mxu1 %vm528_vm0, %v2872_v4  ;;  %p3168_p13 = pneg %p3167_p11 }
  0x3a   : > { %2615 = vmatpush3.bf16.msra.mxu1 %v2873_v6  ;;  %2618 = vmatprep.mubr.msk.bf16.mxu1 %vm528_vm0, %v2875_v8 }
  0x3b   : > { %2616 = vmatprep.subr.bf16.mxu1 %v2874_v9  ;;  %2627 = vmatmul.mubr.msk.bf16.vlgmr.msra.gmra.mxu0 %vm528_vm0, %v2880_v16  ;;  %p3175_p3 = pnand %p3174_p2, %p3168_p13 }
  0x3e   : > { %2617 = vmatpush3.bf16.msra.mxu1 %v2874_v9 }
  0x41   : > { %2619 = vmatmul.mubr.msk.bf16.vlgmr.msra.gmra.mxu1 %vm528_vm0, %v2876_v12 }
  0xa7   : > { %v489_v17 = vpop.permute.xlu0 %488 }
  0xa9   : > { %v595_v25 = vpop.permute.xlu1 %594 }
  0xab   : > { %v494_v22 = vpop.permute.xlu0 %493 }
  0xad   : > { %v600_v32 = vpop.permute.xlu1 %599 }
  0xf9   : > { %v3444_v18 = vpop.f32.mrf.mxu1 }
  0xfa   : > { %4443 = vst [vmem:[#allocation9_spill] sm:$0xff] %v3444_v18 }
  0xfb   : > { %v569_v19 = vpop.f32.mrf.mxu1  ;;  %v3472_v55 = vpop.f32.mrf.mxu0 }
  0xfc   : > { %v570_v20 = vadd.f32 %v569_v19, %v489_v17  ;;  %4447 = vst [vmem:[#allocation13_spill] sm:$0xff] %v3472_v55 }
  0xfd   : > { %v3446_v21 = vpop.f32.mrf.mxu1  ;;  %v3474_v56 = vpop.f32.mrf.mxu0 }
  0xfe   : > { %4444 = vst [vmem:[#allocation10_spill] sm:$0xff] %v3446_v21  ;;  %v797_v23 = vpack.c.bf16 %v570_v20, %v570_v20  ;;  %4448 = vst [vmem:[#allocation14_spill] sm:$0xff] %v3474_v56 }
  0xff   : > { %v572_v24 = vpop.f32.mrf.mxu1  ;;  %v3476_v57 = vpop.f32.mrf.mxu0 }
 0x100   : > { %v573_v26 = vadd.f32 %v572_v24, %v494_v22  ;;  %800 = vxpose.xlu0.c.b16.start.end [1/1] (short) %v797_v23, 128  ;;  %4449 = vst [vmem:[#allocation15_spill] sm:$0xff] %v3476_v57 }
 0x101   : > { %v3448_v27 = vpop.f32.mrf.mxu1  ;;  %v3478_v58 = vpop.f32.mrf.mxu0 }
 0x102   : > { %4445 = vst [vmem:[#allocation11_spill] sm:$0xff] %v3448_v27  ;;  %v1153_v28 = vpack.c.bf16 %v573_v26, %v573_v26  ;;  %4450 = vst [vmem:[#allocation16_spill] sm:$0xff] %v3478_v58 }
 0x103   : > { %v674_v29 = vpop.f32.mrf.mxu1 }
 0x104   : > { %1156 = vxpose.xlu1.c.b16.start.end [1/1] (short) %v1153_v28, 128  ;;  %v675_v30 = vadd.f32 %v674_v29, %v595_v25 }
 0x105   : > { %v3450_v31 = vpop.f32.mrf.mxu1 }
 0x106   : > { %4446 = vst [vmem:[#allocation12_spill] sm:$0xff] %v3450_v31  ;;  %v798_v33 = vpack.c.bf16 %v675_v30, %v675_v30 }
 0x107   : > { %v677_v34 = vpop.f32.mrf.mxu1 }
 0x108   : > { %v843_v35 = vsel %vm841_vm1, %v798_v33, 0  ;;  %v678_v36 = vadd.f32 %v677_v34, %v600_v32  ;;  %2790 = vmatprep.subr.msk.bf16.mxu0 %vm841_vm1, %v798_v33 }
 0x109   : > { %2631 = vmatpush3.bf16.msra.mxu0 %v843_v35 }
 0x10a   : > { %v1154_v37 = vpack.c.bf16 %v678_v36, %v678_v36 }
 0x10c   : > { %v1197_v38 = vsel %vm841_vm1, %v1154_v37, 0  ;;  %2791 = vmatprep.subr.msk.bf16.mxu1 %vm841_vm1, %v1154_v37 }
 0x10d   : > { %2669 = vmatpush3.bf16.msra.mxu1 %v1197_v38 }
 0x162   : > { %v808_v39 = vpop.trf.xlu0 }
 0x163   : > { %2632 = vmatprep.mubr.msk.bf16.mxu0 %vm816_vm2, %v808_v39 }
 0x166   : > { %v1164_v40 = vpop.trf.xlu1  ;;  %v809_v41 = vpop.trf.xlu0 }
 0x167   : > { %2633 = vmatmul.mubr.msk.bf16.vlgmr.msra.gmra.mxu0 %vm816_vm2, %v809_v41  ;;  %2670 = vmatprep.mubr.msk.bf16.mxu1 %vm816_vm2, %v1164_v40 }
 0x16a   : > { %v1165_v42 = vpop.trf.xlu1  ;;  %v810_v43 = vpop.trf.xlu0 }
 0x16b   : > { %2636 = vmatprep.mubr.msk.bf16.mxu0 %vm816_vm2, %v810_v43  ;;  %2671 = vmatmul.mubr.msk.bf16.vlgmr.msra.gmra.mxu1 %vm816_vm2, %v1165_v42 }
 0x16e   : > { %v1166_v44 = vpop.trf.xlu1  ;;  %v811_v45 = vpop.trf.xlu0 }
 0x16f   : > { %2637 = vmatmul.mubr.msk.bf16.gmra.mxu0 %vm816_vm2, %v811_v45  ;;  %2674 = vmatprep.mubr.msk.bf16.mxu1 %vm816_vm2, %v1166_v44 }
 0x172   : > { %v1167_v46 = vpop.trf.xlu1  ;;  %v812_v47 = vpop.trf.xlu0 }
 0x173   : > { %2640 = vmatprep.mubr.msk.bf16.mxu0 %vm816_vm2, %v812_v47  ;;  %2675 = vmatmul.mubr.msk.bf16.gmra.mxu1 %vm816_vm2, %v1167_v46 }
 0x176   : > { %v813_v48 = vpop.trf.xlu0  ;;  %v1168_v49 = vpop.trf.xlu1 }
 0x177   : > { %2641 = vmatmul.mubr.msk.bf16.gmra.mxu0 %vm816_vm2, %v813_v48  ;;  %2678 = vmatprep.mubr.msk.bf16.mxu1 %vm816_vm2, %v1168_v49 }
 0x17a   : > { %v814_v50 = vpop.trf.xlu0  ;;  %v1169_v51 = vpop.trf.xlu1 }
 0x17b   : > { %2679 = vmatmul.mubr.msk.bf16.gmra.mxu1 %vm816_vm2, %v1169_v51  ;;  %2644 = vmatprep.mubr.msk.bf16.mxu0 %vm816_vm2, %v814_v50 }
 0x17e   : > { %v815_v52 = vpop.trf.xlu0  ;;  %v1170_v53 = vpop.trf.xlu1 }
 0x17f   : > { %2645 = vmatmul.mubr.msk.bf16.gmra.mxu0 %vm816_vm2, %v815_v52  ;;  %2682 = vmatprep.mubr.msk.bf16.mxu1 %vm816_vm2, %v1170_v53 }
 0x182   : > { %v1171_v54 = vpop.trf.xlu1 }
 0x183   : > { %2683 = vmatmul.mubr.msk.bf16.gmra.mxu1 %vm816_vm2, %v1171_v54 }
 0x227   : > { %v3480_v59 = vpop.f32.mrf.mxu0 }
 0x228   : > { %v946_v53 = vsel %vm796_vm3, %v3480_v59, -1e+30 }
 0x229   : > { %v3482_v61 = vpop.f32.mrf.mxu0 }
 0x22a   : > { %v3623_v59 = vsel %vm796_vm3, %v3482_v61, -1e+30 }
 0x22b   : > { %v3484_v62 = vpop.f32.mrf.mxu0  ;;  %v3486_v63 = vpop.f32.mrf.mxu1  ;;  %4453 = vst [vmem:[#allocation19_spill] sm:$0xff] %v3623_v59 }
 0x22d   : > { %v3490_v1 = vpop.f32.mrf.mxu0  ;;  %v3492_v2 = vpop.f32.mrf.mxu1 }
 0x22f   : > { %v2638_v3 = vpop.f32.mrf.mxu0  ;;  %v3494_v4 = vpop.f32.mrf.mxu1 }
 0x230   : > { %v3499_v5 = vsel %vm796_vm3, %v2638_v3, -1e+30  ;;  %v1298_v3 = vsel %vm796_vm3, %v3486_v63, -1e+30  ;;  %v3634_v63 = vsel %vm796_vm3, %v3492_v2, -1e+30 }
 0x231   : > { %v3501_v6 = vpop.f32.mrf.mxu1  ;;  %972 = vmax.xlane.f32.xlu1 %v3499_v5  ;;  %v895_v7 = vpop.f32.mrf.mxu0  ;;  %4454 = vst [vmem:[#allocation20_spill] sm:$0xff] %v3634_v63  ;;  %v1299_v61 = vsel %vm796_vm3, %v3494_v4, -1e+30 }
 0x232   : > { %v3506_v10 = vsel %vm796_vm3, %v895_v7, -1e+30  ;;  %v3652_v2 = vsel %vm796_vm3, %v3501_v6, -1e+30 }
 0x233   : > { %v2639_v8 = vpop.f32.mrf.mxu0  ;;  %v2676_v9 = vpop.f32.mrf.mxu1  ;;  %4456 = vst [vmem:[#allocation22_spill] sm:$0xff] %v3652_v2 }
 0x234   : > { %v3510_v11 = vsel %vm796_vm3, %v2639_v8, -1e+30  ;;  %v3516_v16 = vsel %vm796_vm3, %v2676_v9, -1e+30  ;;  %v947_v9 = vsel %vm796_vm3, %v3484_v62, -1e+30 }
 0x235   : > { %v1249_v12 = vpop.f32.mrf.mxu1  ;;  %968 = vmax.xlane.f32.xlu1 %v3506_v10  ;;  %974 = vmax.xlane.f32.xlu0 %v3510_v11  ;;  %v898_v13 = vpop.f32.mrf.mxu0 }
 0x236   : > { %v3596_v51 = vsel %vm796_vm3, %v1249_v12, -1e+30  ;;  %v3609_v54 = vsel %vm796_vm3, %v898_v13, -1e+30  ;;  %v3646_v12 = vsel %vm796_vm3, %v3490_v1, -1e+30 }
 0x237   : > { %v2642_v14 = vpop.f32.mrf.mxu0  ;;  %v2677_v15 = vpop.f32.mrf.mxu1  ;;  %4455 = vst [vmem:[#allocation21_spill] sm:$0xff] %v3646_v12 }
 0x238   : > { %v3520_v17 = vsel %vm796_vm3, %v2677_v15, -1e+30  ;;  %v3526_v23 = vsel %vm796_vm3, %v2642_v14, -1e+30 }
 0x239   : > { %1324 = vmax.xlane.f32.xlu1 %v3516_v16  ;;  %1326 = vmax.xlane.f32.xlu0 %v3520_v17  ;;  %v911_v19 = vpop.f32.mrf.mxu0  ;;  %v1252_v20 = vpop.f32.mrf.mxu1 }
 0x23a   : > { %v3536_v28 = vsel %vm796_vm3, %v911_v19, -1e+30  ;;  %v3627_v8 = vsel %vm796_vm3, %v1252_v20, -1e+30 }
 0x23b   : > { %v2643_v22 = vpop.f32.mrf.mxu0  ;;  %v2680_v25 = vpop.f32.mrf.mxu1 }
 0x23c   : > { %v3530_v24 = vsel %vm796_vm3, %v2643_v22, -1e+30  ;;  %v3546_v33 = vsel %vm796_vm3, %v2680_v25, -1e+30 }
 0x23d   : > { %980 = vmax.xlane.f32.xlu1 %v3526_v23  ;;  %982 = vmax.xlane.f32.xlu0 %v3530_v24  ;;  %v914_v26 = vpop.f32.mrf.mxu0  ;;  %v1265_v32 = vpop.f32.mrf.mxu1 }
 0x23e   : > { %v3540_v29 = vsel %vm796_vm3, %v914_v26, -1e+30  ;;  %v3556_v36 = vsel %vm796_vm3, %v1265_v32, -1e+30 }
 0x23f   : > { %v2646_v30 = vpop.f32.mrf.mxu0  ;;  %v2681_v35 = vpop.f32.mrf.mxu1 }
 0x240   : > { %v3550_v34 = vsel %vm796_vm3, %v2646_v30, -1e+30  ;;  %v3560_v37 = vsel %vm796_vm3, %v2681_v35, -1e+30 }
 0x241   : > { %976 = vmax.xlane.f32.xlu1 %v3536_v28  ;;  %978 = vmax.xlane.f32.xlu0 %v3540_v29  ;;  %v927_v38 = vpop.f32.mrf.mxu0  ;;  %v1268_v39 = vpop.f32.mrf.mxu1 }
 0x242   : > { %v3566_v40 = vsel %vm796_vm3, %v1268_v39, -1e+30  ;;  %v3570_v41 = vsel %vm796_vm3, %v927_v38, -1e+30 }
 0x243   : > { %v2647_v42 = vpop.f32.mrf.mxu0  ;;  %v2684_v43 = vpop.f32.mrf.mxu1 }
 0x244   : > { %v3576_v44 = vsel %vm796_vm3, %v2684_v43, -1e+30  ;;  %v3580_v45 = vsel %vm796_vm3, %v2647_v42, -1e+30 }
 0x245   : > { %1332 = vmax.xlane.f32.xlu1 %v3546_v33  ;;  %988 = vmax.xlane.f32.xlu0 %v3550_v34  ;;  %v930_v46 = vpop.f32.mrf.mxu0  ;;  %v1281_v47 = vpop.f32.mrf.mxu1 }
 0x246   : > { %v3586_v48 = vsel %vm796_vm3, %v1281_v47, -1e+30  ;;  %v3590_v49 = vsel %vm796_vm3, %v930_v46, -1e+30 }
 0x247   : > { %v2685_v50 = vpop.f32.mrf.mxu1 }
 0x248   : > { %v3600_v52 = vsel %vm796_vm3, %v2685_v50, -1e+30 }
 0x249   : > { %1328 = vmax.xlane.f32.xlu1 %v3556_v36  ;;  %1334 = vmax.xlane.f32.xlu0 %v3560_v37  ;;  %v1284_v60 = vpop.f32.mrf.mxu1 }
 0x24a   : > { %v3617_v7 = vsel %vm796_vm3, %v1284_v60, -1e+30 }
 0x24b   : > { %4452 = vst [vmem:[#allocation18_spill] sm:$0xff] %v3617_v7 }
 0x24d   : > { %1330 = vmax.xlane.f32.xlu0 %v3566_v40  ;;  %984 = vmax.xlane.f32.xlu1 %v3570_v41 }
 0x251   : > { %1340 = vmax.xlane.f32.xlu0 %v3576_v44  ;;  %990 = vmax.xlane.f32.xlu1 %v3580_v45 }
 0x255   : > { %1336 = vmax.xlane.f32.xlu1 %v3586_v48  ;;  %986 = vmax.xlane.f32.xlu0 %v3590_v49 }
 0x259   : > { %1320 = vmax.xlane.f32.xlu1 %v3596_v51  ;;  %1342 = vmax.xlane.f32.xlu0 %v3600_v52 }
 0x25d   : > { %964 = vmax.xlane.f32.xlu1 %v946_v53  ;;  %970 = vmax.xlane.f32.xlu0 %v3609_v54 }
 0x261   : > { %1316 = vmax.xlane.f32.xlu1 %v1298_v3  ;;  %1338 = vmax.xlane.f32.xlu0 %v3617_v7 }
 0x265   : > { %960 = vmax.xlane.f32.xlu1 %v3623_v59  ;;  %1322 = vmax.xlane.f32.xlu0 %v3627_v8 }
 0x269   : > { %1312 = vmax.xlane.f32.xlu1 %v3634_v63  ;;  %966 = vmax.xlane.f32.xlu0 %v947_v9 }
 0x26d   : > { %1318 = vmax.xlane.f32.xlu0 %v1299_v61 }
 0x271   : > { %962 = vmax.xlane.f32.xlu0 %v3646_v12 }
 0x275   : > { %1314 = vmax.xlane.f32.xlu0 %v3652_v2 }
 0x2ba   : > { %v973_v62 = vpop.xlane.xlu1 %972 }
 0x2bb   : > { %v998_v56 = vsub.f32 %v3499_v5, %v973_v62 }
 0x2bd   : > { %v1020_v18 = vmul.f32 1.442695, %v998_v56 }
 0x2be   : > { %v969_v13 = vpop.xlane.xlu1 %968  ;;  %v975_v14 = vpop.xlane.xlu0 %974 }
 0x2bf   : > { %v996_v2 = vsub.f32 %v3506_v10, %v969_v13 }
 0x2c1   : > { %v1016_v59 = vmul.f32 1.442695, %v996_v2 }
 0x2c2   : > { %v1325_v15 = vpop.xlane.xlu1 %1324  ;;  %v3655_v4 = vpop.xlane.xlu0 %1326 }
 0x2c3   : > { %v1350_v12 = vsub.f32 %v3516_v16, %v1325_v15 }
 0x2c6   : > { %v981_v19 = vpop.xlane.xlu1 %980  ;;  %v3657_v20 = vpop.xlane.xlu0 %982 }
 0x2c7   : > { %v1003_v13 = vsub.f32 %v3530_v24, %v3657_v20 }
 0x2ca   : > { %v977_v1 = vpop.xlane.xlu1 %976  ;;  %v3659_v22 = vpop.xlane.xlu0 %978 }
 0x2ce   : > { %v3661_v25 = vpop.xlane.xlu1 %1332  ;;  %v3663_v26 = vpop.xlane.xlu0 %988 }
 0x2d2   : > { %v3665_v6 = vpop.xlane.xlu1 %1328  ;;  %v3667_v30 = vpop.xlane.xlu0 %1334 }
 0x2d3   : > { %v1352_v62 = vsub.f32 %v3556_v36, %v3665_v6  ;;  %v1001_v36 = vsub.f32 %v3540_v29, %v3659_v22 }
 0x2d6   : > { %v3669_v32 = vpop.xlane.xlu1 %984  ;;  %v3671_v35 = vpop.xlane.xlu0 %1330 }
 0x2d7   : > { %v1004_v20 = vsub.f32 %v3570_v41, %v3669_v32  ;;  %v1353_v32 = vsub.f32 %v3566_v40, %v3671_v35 }
 0x2d9   : > { %v1032_v22 = vmul.f32 1.442695, %v1004_v20  ;;  %v4461_v20 = vld [vmem:[#allocation22_spill] sm:$0xff] }
 0x2da   : > { %v3673_v38 = vpop.xlane.xlu1 %990  ;;  %v3675_v39 = vpop.xlane.xlu0 %1340 }
 0x2de   : > { %v3677_v42 = vpop.xlane.xlu1 %1336  ;;  %v3679_v43 = vpop.xlane.xlu0 %986 }
 0x2e2   : > { %v1321_v46 = vpop.xlane.xlu1 %1320  ;;  %v3681_v47 = vpop.xlane.xlu0 %1342 }
 0x2e3   : > { %v1348_v5 = vsub.f32 %v3596_v51, %v1321_v46 }
 0x2e6   : > { %v965_v50 = vpop.xlane.xlu1 %964  ;;  %v971_v60 = vpop.xlane.xlu0 %970 }
 0x2e7   : > { %v994_v57 = vsub.f32 %v946_v53, %v965_v50  ;;  %v1372_v50 = vmul.f32 1.442695, %v1350_v12 }
 0x2e9   : > { %v1012_v55 = vmul.f32 1.442695, %v994_v57 }
 0x2ea   : > { %v1317_v0 = vpop.xlane.xlu1 %1316  ;;  %v3683_v58 = vpop.xlane.xlu0 %1338 }
 0x2eb   : > { %2883 = vpow2.f32 %v1012_v55  ;;  %v1346_v31 = vsub.f32 %v1298_v3, %v1317_v0  ;;  %v997_v3 = vsub.f32 %v3609_v54, %v971_v60  ;;  %v1354_v54 = vsub.f32 %v3546_v33, %v3661_v25 }
 0x2ec   : > { %v1355_v25 = vsub.f32 %v3560_v37, %v3667_v30  ;;  %v1356_v30 = vsub.f32 %v3586_v48, %v3677_v42  ;;  %v1005_v48 = vsub.f32 %v3590_v49, %v3679_v43 }
 0x2ed   : > { %v1364_v27 = vmul.f32 1.442695, %v1346_v31  ;;  %v999_v31 = vsub.f32 %v3510_v11, %v975_v14  ;;  %v1380_v2 = vmul.f32 1.442695, %v1354_v54  ;;  %v1376_v14 = vmul.f32 1.442695, %v1352_v62 }
 0x2ee   : > { %v1323_v21 = vpop.xlane.xlu0 %1322  ;;  %v1382_v41 = vmul.f32 1.442695, %v1355_v25  ;;  %v1384_v40 = vmul.f32 1.442695, %v1356_v30  ;;  %v4459_v62 = vld [vmem:[#allocation20_spill] sm:$0xff]  ;;  %v590_v30 = vld [vmem:[%s4418_s6 + $0x10] sm:$0xff] }
 0x2ef   : > { %2885 = vpow2.f32 %v1364_v27  ;;  %v1368_v27 = vmul.f32 1.442695, %v1348_v5  ;;  %v1022_v16 = vmul.f32 1.442695, %v999_v31 }
 0x2f0   : > { %2887 = vpow2.f32 %v1020_v18  ;;  %v1002_v18 = vsub.f32 %v3526_v23, %v981_v19  ;;  %v1018_v23 = vmul.f32 1.442695, %v997_v3 }
 0x2f1   : > { %2889 = vpow2.f32 %v1016_v59  ;;  %v1351_v59 = vsub.f32 %v3520_v17, %v3655_v4  ;;  %v1030_v4 = vmul.f32 1.442695, %v1003_v13 }
 0x2f2   : > { %v967_v63 = vpop.xlane.xlu0 %966  ;;  %v1028_v51 = vmul.f32 1.442695, %v1002_v18 }
 0x2f3   : > { %v995_v53 = vsub.f32 %v947_v9, %v967_v63 }
 0x2f5   : > { %v1014_v57 = vmul.f32 1.442695, %v995_v53 }
 0x2f6   : > { %v1319_v7 = vpop.xlane.xlu0 %1318 }
 0x2f7   : > { %v1347_v55 = vsub.f32 %v1299_v61, %v1319_v7  ;;  %2891 = vpow2.f32 %v1014_v57  ;;  %v1000_v7 = vsub.f32 %v3536_v28, %v977_v1  ;;  %v1374_v61 = vmul.f32 1.442695, %v1351_v59 }
 0x2f8   : > { %v3689_v0 = vpop.eup %2883  ;;  %2893 = vpow2.f32 %v1372_v50  ;;  %v1349_v28 = vsub.f32 %v3627_v8, %v1323_v21  ;;  %v1006_v8 = vsub.f32 %v3550_v34, %v3663_v26  ;;  %v1026_v1 = vmul.f32 1.442695, %v1001_v36 }
 0x2f9   : > { %v1366_v56 = vmul.f32 1.442695, %v1347_v55  ;;  %1044 = vadd.xlane.f32.xlu1 %v3689_v0  ;;  %v1024_v63 = vmul.f32 1.442695, %v1000_v7  ;;  %v1358_v26 = vsub.f32 %v3576_v44, %v3675_v39  ;;  %v1378_v44 = vmul.f32 1.442695, %v1353_v32 }
 0x2fa   : > { %v1370_v21 = vmul.f32 1.442695, %v1349_v28  ;;  %v1036_v24 = vmul.f32 1.442695, %v1006_v8  ;;  %v1007_v39 = vsub.f32 %v3580_v45, %v3673_v38  ;;  %v1034_v38 = vmul.f32 1.442695, %v1005_v48  ;;  %v963_v8 = vpop.xlane.xlu0 %962 }
 0x2fb   : > { %2895 = vpow2.f32 %v1366_v56  ;;  %v1388_v37 = vmul.f32 1.442695, %v1358_v26  ;;  %v1359_v50 = vsub.f32 %v3600_v52, %v3681_v47  ;;  %v4457_v55 = vld [vmem:[#allocation18_spill] sm:$0xff]  ;;  %v484_v7 = vld [vmem:[%s4416_s4 + $0x10] sm:$0xff]  ;;  %v4431_v59 = vmov 0.0  }
 0x2fc   : > { %v3694_v10 = vpop.eup %2885  ;;  %2897 = vpow2.f32 %v1368_v27  ;;  %v1038_v57 = vmul.f32 1.442695, %v1007_v39  ;;  %v1357_v31 = vsub.f32 %v4457_v55, %v3683_v58  ;;  %2648 = vmatprep.subr.bf16.mxu0 %v4431_v59  ;;  %2686 = vmatprep.subr.bf16.mxu1 %v4431_v59  ;;  %v485_v28 = vld [vmem:[%s4416_s4 + $0x18] sm:$0xff] }
 0x2fd   : > { %1396 = vadd.xlane.f32.xlu1 %v3694_v10  ;;  %v3699_v11 = vpop.eup %2887  ;;  %2899 = vpow2.f32 %v1022_v16  ;;  %v1390_v43 = vmul.f32 1.442695, %v1359_v50  ;;  %2664 = vmatprep.mubr.msk.bf16.mxu0 %vm3252_vm4, %v4431_v59 }
 0x2fe   : > { %2901 = vpow2.f32 %v1028_v51  ;;  %v3706_v9 = vpop.eup %2889  ;;  %v1386_v47 = vmul.f32 1.442695, %v1357_v31  ;;  %v1315_v36 = vpop.xlane.xlu0 %1314  ;;  %2702 = vmatprep.mubr.msk.bf16.mxu1 %vm3252_vm4, %v4431_v59 }
 0x2ff   : > { %2903 = vpow2.f32 %v1018_v23  ;;  %v961_v23 = vpop.xlane.xlu1 %960 }
 0x300   : > { %2905 = vpow2.f32 %v1024_v63  ;;  %v4458_v63 = vld [vmem:[#allocation19_spill] sm:$0xff] }
 0x301   : > { %1052 = vadd.xlane.f32.xlu1 %v3699_v11  ;;  %2907 = vpow2.f32 %v1374_v61  ;;  %v992_v54 = vsub.f32 %v4458_v63, %v961_v23 }
 0x302   : > { %2909 = vpow2.f32 %v1380_v2 }
 0x303   : > { %2911 = vpow2.f32 %v1370_v21  ;;  %v1313_v61 = vpop.xlane.xlu1 %1312  ;;  %v1008_v2 = vmul.f32 1.442695, %v992_v54 }
 0x304   : > { %v3709_v12 = vpop.eup %2891  ;;  %2913 = vpow2.f32 %v1376_v14  ;;  %v1344_v13 = vsub.f32 %v4459_v62, %v1313_v61  ;;  %v4460_v14 = vld [vmem:[#allocation21_spill] sm:$0xff] }
 0x305   : > { %1048 = vadd.xlane.f32.xlu1 %v3706_v9  ;;  %1046 = vadd.xlane.f32.xlu0 %v3709_v12  ;;  %v3713_v17 = vpop.eup %2893  ;;  %2915 = vpow2.f32 %v1030_v4  ;;  %v993_v4 = vsub.f32 %v4460_v14, %v963_v8 }
 0x306   : > { %2917 = vpow2.f32 %v1036_v24  ;;  %v1360_v21 = vmul.f32 1.442695, %v1344_v13 }
 0x307   : > { %2919 = vpow2.f32 %v1026_v1  ;;  %v1010_v24 = vmul.f32 1.442695, %v993_v4  ;;  %v1345_v1 = vsub.f32 %v4461_v20, %v1315_v36 }
 0x308   : > { %v3717_v33 = vpop.eup %2895  ;;  %2921 = vpow2.f32 %v1032_v22 }
 0x309   : > { %1404 = vadd.xlane.f32.xlu1 %v3713_v17  ;;  %1398 = vadd.xlane.f32.xlu0 %v3717_v33  ;;  %v3725_v15 = vpop.eup %2897  ;;  %2923 = vpow2.f32 %v1382_v41  ;;  %v1362_v22 = vmul.f32 1.442695, %v1345_v1 }
 0x30a   : > { %v3729_v19 = vpop.eup %2899  ;;  %2925 = vpow2.f32 %v1388_v37  ;;  %v693_v37 = vld [vmem:[%s4420_s8] sm:$0xff] }
 0x30b   : > { %v3735_v34 = vpop.eup %2901  ;;  %2927 = vpow2.f32 %v1378_v44  ;;  %v591_v44 = vld [vmem:[%s4418_s6 + $0x18] sm:$0xff] }
 0x30c   : > { %v3739_v29 = vpop.eup %2903  ;;  %2929 = vpow2.f32 %v1384_v40 }
 0x30d   : > { %1400 = vadd.xlane.f32.xlu1 %v3725_v15  ;;  %1054 = vadd.xlane.f32.xlu0 %v3729_v19  ;;  %v3745_v6 = vpop.eup %2905  ;;  %2931 = vpow2.f32 %v1038_v57  ;;  %v694_v57 = vld [vmem:[%s4420_s8 + $0x8] sm:$0xff] }
 0x30e   : > { %v3749_v46 = vpop.eup %2907  ;;  %2933 = vpow2.f32 %v1034_v38 }
 0x30f   : > { %v3755_v60 = vpop.eup %2909  ;;  %2935 = vpow2.f32 %v1390_v43 }
 0x310   : > { %v3759_v53 = vpop.eup %2911  ;;  %2937 = vpow2.f32 %v1386_v47 }
 0x311   : > { %1060 = vadd.xlane.f32.xlu1 %v3735_v34  ;;  %1050 = vadd.xlane.f32.xlu0 %v3739_v29  ;;  %v3763_v35 = vpop.eup %2913  ;;  %2939 = vpow2.f32 %v1008_v2 }
 0x312   : > { %v3767_v42 = vpop.eup %2915  ;;  %2941 = vpow2.f32 %v1360_v21 }
 0x313   : > { %v3771_v45 = vpop.eup %2917  ;;  %2943 = vpow2.f32 %v1010_v24 }
 0x314   : > { %v3775_v5 = vpop.eup %2919  ;;  %2945 = vpow2.f32 %v1362_v22  ;;  %v4464_v22 = vld [vmem:[#allocation9_spill] sm:$0xff] }
 0x315   : > { %1056 = vadd.xlane.f32.xlu1 %v3745_v6  ;;  %1406 = vadd.xlane.f32.xlu0 %v3749_v46  ;;  %v3779_v49 = vpop.eup %2921 }
 0x316   : > { %v3783_v56 = vpop.eup %2923 }
 0x317   : > { %v3787_v52 = vpop.eup %2925 }
 0x318   : > { %v3789_v18 = vpop.eup %2927 }
 0x319   : > { %1412 = vadd.xlane.f32.xlu1 %v3755_v60  ;;  %1402 = vadd.xlane.f32.xlu0 %v3759_v53  ;;  %v3793_v27 = vpop.eup %2929 }
 0x31a   : > { %v3795_v58 = vpop.eup %2931 }
 0x31b   : > { %v3799_v16 = vpop.eup %2933 }
 0x31c   : > { %v3802_v3 = vpop.eup %2935 }
 0x31d   : > { %1408 = vadd.xlane.f32.xlu1 %v3763_v35  ;;  %1062 = vadd.xlane.f32.xlu0 %v3767_v42  ;;  %v3805_v51 = vpop.eup %2937 }
 0x31e   : > { %v3820_v25 = vpop.eup %2939 }
 0x31f   : > { %v3823_v26 = vpop.eup %2941 }
 0x320   : > { %4462 = vst [vmem:[#allocation18_spill] sm:$0xff] %v3823_v26  ;;  %v3826_v41 = vpop.eup %2943 }
 0x321   : > { %1068 = vadd.xlane.f32.xlu1 %v3771_v45  ;;  %1058 = vadd.xlane.f32.xlu0 %v3775_v5  ;;  %v3829_v32 = vpop.eup %2945 }
 0x322   : > { %4463 = vst [vmem:[#allocation19_spill] sm:$0xff] %v3829_v32 }
 0x325   : > { %1064 = vadd.xlane.f32.xlu1 %v3779_v49  ;;  %1414 = vadd.xlane.f32.xlu0 %v3783_v56 }
 0x329   : > { %1420 = vadd.xlane.f32.xlu1 %v3787_v52  ;;  %1410 = vadd.xlane.f32.xlu0 %v3789_v18 }
 0x32d   : > { %1416 = vadd.xlane.f32.xlu1 %v3793_v27  ;;  %1070 = vadd.xlane.f32.xlu0 %v3795_v58 }
 0x331   : > { %1066 = vadd.xlane.f32.xlu0 %v3799_v16 }
 0x335   : > { %1422 = vadd.xlane.f32.xlu0 %v3802_v3 }
 0x339   : > { %1418 = vadd.xlane.f32.xlu0 %v3805_v51 }
 0x33e   : > { %498 = vperm.xlu1 %2868, %v484_v7  }
 0x34f   : > { %503 = vperm.xlu0 %2867, %v485_v28  }
 0x362   : > { %1040 = vadd.xlane.f32.xlu1 %v3820_v25 }
 0x366   : > { %1392 = vadd.xlane.f32.xlu1 %v3823_v26 }
 0x36e   : > { %1042 = vadd.xlane.f32.xlu0 %v3826_v41 }
 0x372   : > { %1394 = vadd.xlane.f32.xlu0 %v3829_v32 }
 0x377   : > { %699 = vperm.xlu1 %2868, %v693_v37  }
 0x37b   : > { %604 = vperm.xlu1 %2868, %v590_v30  }
 0x37f   : > { %609 = vperm.xlu1 %2868, %v591_v44  }
 0x382   : > { %v3841_v39 = vpop.xlane.xlu1 %1044 }
 0x386   : > { %v3843_v40 = vpop.xlane.xlu1 %1396 }
 0x388   : > { %704 = vperm.xlu0 %2867, %v694_v57  }
 0x38a   : > { %v3848_v48 = vpop.xlane.xlu1 %1052 }
 0x38e   : > { %v3850_v38 = vpop.xlane.xlu1 %1048  ;;  %v3852_v50 = vpop.xlane.xlu0 %1046 }
 0x392   : > { %v3858_v43 = vpop.xlane.xlu1 %1404  ;;  %v3860_v55 = vpop.xlane.xlu0 %1398 }
 0x396   : > { %v3862_v31 = vpop.xlane.xlu1 %1400  ;;  %v3864_v47 = vpop.xlane.xlu0 %1054 }
 0x39a   : > { %v1061_v7 = vpop.xlane.xlu1 %1060  ;;  %v3866_v23 = vpop.xlane.xlu0 %1050 }
 0x39e   : > { %v1057_v63 = vpop.xlane.xlu1 %1056  ;;  %v3868_v54 = vpop.xlane.xlu0 %1406 }
 0x3a2   : > { %v1413_v61 = vpop.xlane.xlu1 %1412  ;;  %v3870_v28 = vpop.xlane.xlu0 %1402 }
 0x3a6   : > { %v3872_v2 = vpop.xlane.xlu1 %1408  ;;  %v1063_v62 = vpop.xlane.xlu0 %1062 }
 0x3aa   : > { %v1069_v13 = vpop.xlane.xlu1 %1068  ;;  %v1059_v21 = vpop.xlane.xlu0 %1058 }
 0x3ab   : > { %2947 = vrcp.f32 %v1069_v13 }
 0x3ae   : > { %v1065_v8 = vpop.xlane.xlu1 %1064  ;;  %v1415_v14 = vpop.xlane.xlu0 %1414 }
 0x3b2   : > { %v1421_v4 = vpop.xlane.xlu1 %1420  ;;  %v1411_v36 = vpop.xlane.xlu0 %1410 }
 0x3b6   : > { %v1417_v24 = vpop.xlane.xlu1 %1416  ;;  %v1071_v20 = vpop.xlane.xlu0 %1070 }
 0x3b7   : > { %2949 = vrcp.f32 %v1071_v20 }
 0x3b8   : > { %v2948_v59 = vpop.eup %2947 }
 0x3b9   : > { %v1102_v13 = vmul.f32 %v2948_v59, %v3771_v45 }
 0x3ba   : > { %v499_v1 = vpop.permute.xlu1 %498  ;;  %v1067_v30 = vpop.xlane.xlu0 %1066 }
 0x3bb   : > { %v578_v37 = vadd.f32 %v4464_v22, %v499_v1  ;;  %2951 = vrcp.f32 %v1067_v30 }
 0x3bc   : > { %2953 = vrcp.f32 %v1065_v8 }
 0x3bd   : > { %v1505_v44 = vpack.c.bf16 %v578_v37, %v578_v37  ;;  %2955 = vrcp.f32 %v1421_v4  ;;  %v4465_v37 = vmov 0.0  }
 0x3be   : > { %v1423_v57 = vpop.xlane.xlu0 %1422 }
 0x3bf   : > { %1508 = vxpose.xlu0.c.b16.start.end [1/1] (short) %v1505_v44, 128  ;;  %2957 = vrcp.f32 %v1423_v57 }
 0x3c0   : > { %2959 = vrcp.f32 %v1063_v62  ;;  %v4466_v62 = vld [vmem:[#allocation10_spill] sm:$0xff] }
 0x3c2   : > { %v1419_v32 = vpop.xlane.xlu0 %1418 }
 0x3c3   : > { %2961 = vrcp.f32 %v1419_v32 }
 0x3c4   : > { %v2950_v26 = vpop.eup %2949  ;;  %2963 = vrcp.f32 %v1061_v7 }
 0x3c5   : > { %2965 = vrcp.f32 %v1417_v24  ;;  %v1103_v20 = vmul.f32 %v2950_v26, %v3795_v58 }
 0x3c6   : > { %2967 = vrcp.f32 %v1057_v63 }
 0x3c7   : > { %v1111_v1 = vpack.c.bf16 %v1103_v20, %v1102_v13  ;;  %2969 = vrcp.f32 %v1059_v21 }
 0x3c8   : > { %v2952_v22 = vpop.eup %2951  ;;  %2971 = vrcp.f32 %v1415_v14 }
 0x3c9   : > { %v2954_v30 = vpop.eup %2953  ;;  %2649 = vmatpush3.bf16.xpose.msra.mxu0 %v1111_v1  ;;  %v1101_v7 = vmul.f32 %v2952_v22, %v3799_v16  ;;  %2973 = vrcp.f32 %v1413_v61 }
 0x3ca   : > { %v2956_v8 = vpop.eup %2955  ;;  %v504_v4 = vpop.permute.xlu0 %503  ;;  %2650 = vmatprep.subr.bf16.mxu0 %v4465_v37  ;;  %v1100_v58 = vmul.f32 %v2954_v30, %v3779_v49  ;;  %2975 = vrcp.f32 %v3864_v47 }
 0x3cb   : > { %v581_v32 = vadd.f32 %v4466_v62, %v504_v4  ;;  %v1454_v59 = vmul.f32 %v2956_v8, %v3787_v52  ;;  %2977 = vrcp.f32 %v1411_v36 }
 0x3cc   : > { %v2958_v24 = vpop.eup %2957  ;;  %v1110_v21 = vpack.c.bf16 %v1101_v7, %v1100_v58  ;;  %2979 = vrcp.f32 %v3848_v48 }
 0x3cd   : > { %v1857_v45 = vpack.c.bf16 %v581_v32, %v581_v32  ;;  %v1455_v26 = vmul.f32 %v2958_v24, %v3802_v3  ;;  %v2960_v63 = vpop.eup %2959  ;;  %2981 = vrcp.f32 %v3872_v2 }
 0x3ce   : > { %v1099_v49 = vmul.f32 %v2960_v63, %v3767_v42  ;;  %2983 = vrcp.f32 %v3866_v23 }
 0x3cf   : > { %1860 = vxpose.xlu1.c.b16.start.end [1/1] (short) %v1857_v45, 128  ;;  %v1463_v44 = vpack.c.bf16 %v1455_v26, %v1454_v59  ;;  %2985 = vrcp.f32 %v3868_v54 }
 0x3d0   : > { %v2962_v57 = vpop.eup %2961  ;;  %2987 = vrcp.f32 %v3850_v38 }
 0x3d1   : > { %v2964_v13 = vpop.eup %2963  ;;  %2651 = vmatpush3.bf16.xpose.msra.mxu0 %v1110_v21  ;;  %2687 = vmatpush3.bf16.xpose.msra.mxu1 %v1463_v44  ;;  %v1453_v52 = vmul.f32 %v2962_v57, %v3805_v51  ;;  %2989 = vrcp.f32 %v3858_v43 }
 0x3d2   : > { %v2966_v14 = vpop.eup %2965  ;;  %2652 = vmatprep.subr.bf16.mxu0 %v4465_v37  ;;  %2688 = vmatprep.subr.bf16.mxu1 %v4465_v37  ;;  %v1098_v16 = vmul.f32 %v2964_v13, %v3735_v34  ;;  %2991 = vrcp.f32 %v3852_v50 }
 0x3d3   : > { %v1452_v3 = vmul.f32 %v2966_v14, %v3793_v27  ;;  %v2968_v61 = vpop.eup %2967  ;;  %2993 = vrcp.f32 %v3870_v28 }
 0x3d4   : > { %v2970_v20 = vpop.eup %2969  ;;  %v1109_v47 = vpack.c.bf16 %v1099_v49, %v1098_v16  ;;  %v1096_v27 = vmul.f32 %v2968_v61, %v3745_v6  ;;  %2995 = vrcp.f32 %v3841_v39  ;;  %v4467_v49 = vld [vmem:[#allocation11_spill] sm:$0xff] }
 0x3d5   : > { %v1462_v1 = vpack.c.bf16 %v1453_v52, %v1452_v3  ;;  %v2972_v22 = vpop.eup %2971  ;;  %v1097_v34 = vmul.f32 %v2970_v20, %v3775_v5  ;;  %2997 = vrcp.f32 %v3862_v31 }
 0x3d6   : > { %v2974_v30 = vpop.eup %2973  ;;  %v1451_v42 = vmul.f32 %v2972_v22, %v3783_v56  ;;  %2999 = vrcp.f32 %v3860_v55  ;;  %v4468_v22 = vld [vmem:[#allocation12_spill] sm:$0xff] }
 0x3d7   : > { %v1450_v51 = vmul.f32 %v2974_v30, %v3755_v60  ;;  %v2976_v48 = vpop.eup %2975  ;;  %v1108_v23 = vpack.c.bf16 %v1097_v34, %v1096_v27  ;;  %3001 = vrcp.f32 %v3843_v40  ;;  %v4469_v30 = vld [vmem:[#allocation18_spill] sm:$0xff] }
 0x3d8   : > { %v2978_v36 = vpop.eup %2977  ;;  %v1095_v6 = vmul.f32 %v2976_v48, %v3729_v19 }
 0x3d9   : > { %2653 = vmatpush3.bf16.xpose.msra.mxu0 %v1109_v47  ;;  %2689 = vmatpush3.bf16.xpose.msra.mxu1 %v1462_v1  ;;  %v1461_v2 = vpack.c.bf16 %v1451_v42, %v1450_v51  ;;  %v2980_v8 = vpop.eup %2979  ;;  %v1449_v60 = vmul.f32 %v2978_v36, %v3789_v18  ;;  %v4470_v42 = vld [vmem:[#allocation19_spill] sm:$0xff]  ;;  %v4471_v51 = vld [vmem:[#allocation14_spill] sm:$0xff]  ;;  %v4472_v36 = vld [vmem:[#allocation16_spill] sm:$0xff] }
 0x3da   : > { %2654 = vmatprep.subr.bf16.mxu0 %v4465_v37  ;;  %2690 = vmatprep.subr.bf16.mxu1 %v4465_v37  ;;  %v2982_v54 = vpop.eup %2981  ;;  %v1094_v5 = vmul.f32 %v2980_v8, %v3699_v11 }
 0x3db   : > { %v1448_v56 = vmul.f32 %v2982_v54, %v3763_v35  ;;  %v2984_v38 = vpop.eup %2983 }
 0x3dc   : > { %v1107_v50 = vpack.c.bf16 %v1095_v6, %v1094_v5  ;;  %v2986_v4 = vpop.eup %2985  ;;  %v1093_v19 = vmul.f32 %v2984_v38, %v3739_v29 }
 0x3dd   : > { %v1460_v43 = vpack.c.bf16 %v1449_v60, %v1448_v56  ;;  %v2988_v62 = vpop.eup %2987  ;;  %v1447_v11 = vmul.f32 %v2986_v4, %v3749_v46 }
 0x3de   : > { %v2990_v28 = vpop.eup %2989  ;;  %v1092_v35 = vmul.f32 %v2988_v62, %v3706_v9 }
 0x3df   : > { %v1446_v18 = vmul.f32 %v2990_v28, %v3713_v17  ;;  %v2992_v31 = vpop.eup %2991 }
 0x3e0   : > { %v1106_v32 = vpack.c.bf16 %v1093_v19, %v1092_v35  ;;  %v2994_v24 = vpop.eup %2993  ;;  %v1091_v29 = vmul.f32 %v2992_v31, %v3709_v12 }
 0x3e1   : > { %2655 = vmatpush3.bf16.xpose.msra.mxu0 %v1108_v23  ;;  %2691 = vmatpush3.bf16.xpose.msra.mxu1 %v1461_v2  ;;  %v1459_v7 = vpack.c.bf16 %v1447_v11, %v1446_v18  ;;  %v2996_v45 = vpop.eup %2995  ;;  %v1445_v46 = vmul.f32 %v2994_v24, %v3759_v53 }
 0x3e2   : > { %2656 = vmatprep.subr.bf16.mxu0 %v4465_v37  ;;  %2692 = vmatprep.subr.bf16.mxu1 %v4465_v37  ;;  %v2998_v58 = vpop.eup %2997  ;;  %v1090_v17 = vmul.f32 %v2996_v45, %v3689_v0 }
 0x3e3   : > { %v1444_v40 = vmul.f32 %v2998_v58, %v3725_v15  ;;  %v3000_v63 = vpop.eup %2999 }
 0x3e4   : > { %v1105_v59 = vpack.c.bf16 %v1091_v29, %v1090_v17  ;;  %v3002_v21 = vpop.eup %3001  ;;  %v1443_v0 = vmul.f32 %v3000_v63, %v3717_v33 }
 0x3e5   : > { %v1458_v26 = vpack.c.bf16 %v1445_v46, %v1444_v40  ;;  %v1442_v15 = vmul.f32 %v3002_v21, %v3694_v10 }
 0x3e7   : > { %v1457_v53 = vpack.c.bf16 %v1443_v0, %v1442_v15 }
 0x3e9   : > { %2657 = vmatpush3.bf16.xpose.msra.mxu0 %v1107_v50  ;;  %2693 = vmatpush3.bf16.xpose.msra.mxu1 %v1460_v43 }
 0x3ea   : > { %2658 = vmatprep.subr.bf16.mxu0 %v4465_v37  ;;  %2694 = vmatprep.subr.bf16.mxu1 %v4465_v37 }
 0x3eb   : > { %v1041_v39 = vpop.xlane.xlu1 %1040 }
 0x3ec   : > { %3003 = vrcp.f32 %v1041_v39 }
 0x3ef   : > { %v1393_v9 = vpop.xlane.xlu1 %1392 }
 0x3f1   : > { %2659 = vmatpush3.bf16.xpose.msra.mxu0 %v1106_v32  ;;  %2695 = vmatpush3.bf16.xpose.msra.mxu1 %v1459_v7 }
 0x3f2   : > { %2660 = vmatprep.subr.bf16.mxu0 %v4465_v37  ;;  %2696 = vmatprep.subr.bf16.mxu1 %v4465_v37 }
 0x3f3   : > { %v700_v44 = vpop.permute.xlu1 %699 }
 0x3f4   : > { %v780_v48 = vadd.f32 %v4471_v51, %v700_v44 }
 0x3f7   : > { %v1043_v55 = vpop.xlane.xlu0 %1042  ;;  %v605_v57 = vpop.permute.xlu1 %604 }
 0x3f8   : > { %3005 = vrcp.f32 %v1043_v55  ;;  %v683_v52 = vadd.f32 %v4467_v49, %v605_v57 }
 0x3f9   : > { %2661 = vmatpush3.bf16.xpose.msra.mxu0 %v1105_v59  ;;  %2697 = vmatpush3.bf16.xpose.msra.mxu1 %v1458_v26  ;;  %3007 = vrcp.f32 %v1393_v9  ;;  %v3004_v13 = vpop.eup %3003 }
 0x3fa   : > { %2698 = vmatprep.subr.bf16.mxu1 %v4465_v37  ;;  %2662 = vmatprep.subr.bf16.mxu0 %v4465_v37  ;;  %v1088_v3 = vmul.f32 %v3004_v13, %v3820_v25  ;;  %v1506_v1 = vpack.c.bf16 %v683_v52, %v683_v52 }
 0x3fb   : > { %v1395_v12 = vpop.xlane.xlu0 %1394  ;;  %v610_v16 = vpop.permute.xlu1 %609 }
 0x3fc   : > { %3009 = vrcp.f32 %v1395_v12  ;;  %v686_v10 = vadd.f32 %v4468_v22, %v610_v16  ;;  %v1549_v54 = vsel %vm841_vm1, %v1506_v1, 0 }
 0x3fe   : > { %v1858_v25 = vpack.c.bf16 %v686_v10, %v686_v10 }
 0x400   : > { %v1901_v60 = vsel %vm841_vm1, %v1858_v25, 0 }
 0x401   : > { %2699 = vmatpush3.bf16.xpose.msra.mxu1 %v1457_v53 }
 0x402   : > { %2700 = vmatprep.subr.bf16.mxu1 %v4465_v37 }
 0x403   : > { %v705_v23 = vpop.permute.xlu0 %704 }
 0x404   : > { %v783_v8 = vadd.f32 %v4472_v36, %v705_v23 }
 0x405   : > { %v3006_v14 = vpop.eup %3005 }
 0x406   : > { %v1089_v61 = vmul.f32 %v3006_v14, %v3826_v41  ;;  %v3008_v20 = vpop.eup %3007  ;;  %v799_v41 = vpack.c.bf16 %v780_v48, %v780_v48  ;;  %v1155_v6 = vpack.c.bf16 %v783_v8, %v783_v8 }
 0x407   : > { %v1440_v34 = vmul.f32 %v3008_v20, %v4469_v30 }
 0x408   : > { %v1104_v47 = vpack.c.bf16 %v1089_v61, %v1088_v3 }
 0x409   : > { %v3010_v33 = vpop.eup %3009 }
 0x40a   : > { %2663 = vmatpush3.bf16.xpose.msra.mxu0 %v1104_v47  ;;  %v1441_v27 = vmul.f32 %v3010_v33, %v4470_v42 }
 0x40b   : > { %2792 = vmatprep.subr.msk.bf16.mxu0 %vm841_vm1, %v1506_v1 }
 0x40c   : > { %v1456_v2 = vpack.c.bf16 %v1441_v27, %v1440_v34 }
 0x40e   : > { %2701 = vmatpush3.bf16.xpose.msra.mxu1 %v1456_v2 }
 0x40f   : > { %2793 = vmatprep.subr.msk.bf16.mxu1 %vm841_vm1, %v1858_v25 }
 0x411   : > { %2665 = vmatmul.mubr.bf16.vlgmr.msra.gmra.mxu0 %v799_v41 }
 0x412   : > { %2707 = vmatpush3.bf16.msra.mxu0 %v1549_v54 }
 0x413   : > { %2724 = vmatprep.subr.bf16.mxu0 %v4465_v37 }
 0x415   : > { %2703 = vmatmul.mubr.bf16.vlgmr.msra.gmra.mxu1 %v1155_v6 }
 0x416   : > { %2745 = vmatpush3.bf16.msra.mxu1 %v1901_v60 }
 0x417   : > { %2762 = vmatprep.subr.bf16.mxu1 %v4465_v37 }
 0x421   : > { %v1516_v5 = vpop.trf.xlu0 }
 0x422   : > { %2708 = vmatprep.mubr.msk.bf16.mxu0 %vm816_vm2, %v1516_v5 }
 0x425   : > { %v1517_v56 = vpop.trf.xlu0 }
 0x426   : > { %2709 = vmatmul.mubr.msk.bf16.vlgmr.msra.gmra.mxu0 %vm816_vm2, %v1517_v56 }
 0x429   : > { %v1518_v38 = vpop.trf.xlu0 }
 0x42a   : > { %2712 = vmatprep.mubr.msk.bf16.mxu0 %vm816_vm2, %v1518_v38 }
 0x42d   : > { %v1519_v50 = vpop.trf.xlu0 }
 0x42e   : > { %2713 = vmatmul.mubr.msk.bf16.gmra.mxu0 %vm816_vm2, %v1519_v50 }
 0x431   : > { %v1520_v43 = vpop.trf.xlu0  ;;  %v1868_v4 = vpop.trf.xlu1 }
 0x432   : > { %2716 = vmatprep.mubr.msk.bf16.mxu0 %vm816_vm2, %v1520_v43  ;;  %2746 = vmatprep.mubr.msk.bf16.mxu1 %vm816_vm2, %v1868_v4 }
 0x435   : > { %v1521_v62 = vpop.trf.xlu0  ;;  %v1869_v28 = vpop.trf.xlu1 }
 0x436   : > { %2717 = vmatmul.mubr.msk.bf16.gmra.mxu0 %vm816_vm2, %v1521_v62  ;;  %2747 = vmatmul.mubr.msk.bf16.vlgmr.msra.gmra.mxu1 %vm816_vm2, %v1869_v28 }
 0x439   : > { %v1522_v19 = vpop.trf.xlu0  ;;  %v1870_v11 = vpop.trf.xlu1 }
 0x43a   : > { %2720 = vmatprep.mubr.msk.bf16.mxu0 %vm816_vm2, %v1522_v19  ;;  %2750 = vmatprep.mubr.msk.bf16.mxu1 %vm816_vm2, %v1870_v11 }
 0x43d   : > { %v1523_v35 = vpop.trf.xlu0  ;;  %v1871_v18 = vpop.trf.xlu1 }
 0x43e   : > { %2721 = vmatmul.mubr.msk.bf16.gmra.mxu0 %vm816_vm2, %v1523_v35  ;;  %2751 = vmatmul.mubr.msk.bf16.gmra.mxu1 %vm816_vm2, %v1871_v18 }
 0x43f   : > { %2740 = vmatprep.mubr.msk.bf16.mxu0 %vm3252_vm4, %v4465_v37 }
 0x441   : > { %v1872_v39 = vpop.trf.xlu1 }
 0x442   : > { %2754 = vmatprep.mubr.msk.bf16.mxu1 %vm816_vm2, %v1872_v39 }
 0x445   : > { %v1873_v31 = vpop.trf.xlu1 }
 0x446   : > { %2755 = vmatmul.mubr.msk.bf16.gmra.mxu1 %vm816_vm2, %v1873_v31 }
 0x449   : > { %v1874_v32 = vpop.trf.xlu1 }
 0x44a   : > { %2758 = vmatprep.mubr.msk.bf16.mxu1 %vm816_vm2, %v1874_v32 }
 0x44d   : > { %v1875_v7 = vpop.trf.xlu1 }
 0x44e   : > { %2759 = vmatmul.mubr.msk.bf16.gmra.mxu1 %vm816_vm2, %v1875_v7 }
 0x44f   : > { %2778 = vmatprep.mubr.msk.bf16.mxu1 %vm3252_vm4, %v4465_v37 }
 0x4d1   : > { %v1146_v24 = vpop.f32.mrf.mxu0 }
 0x4d3   : > { %v2666_v45 = vpop.f32.mrf.mxu0 }
 0x4d5   : > { %v1149_v58 = vpop.f32.mrf.mxu0  ;;  %v1498_v29 = vpop.f32.mrf.mxu1 }
 0x4d6   : > { %v3965_v46 = vpack.c.bf16 %v1498_v29, %v1146_v24 }
 0x4d7   : > { %v2667_v9 = vpop.f32.mrf.mxu0  ;;  %v2704_v17 = vpop.f32.mrf.mxu1 }
 0x4d9   : > { %v1501_v40 = vpop.f32.mrf.mxu1 }
 0x4db   : > { %v2705_v55 = vpop.f32.mrf.mxu1 }
 0x4e6   : > { %v3967_v59 = vpop.f32.mrf.mxu0 }
 0x4e7   : > { %v4104_v45 = vsel %vm796_vm3, %v3967_v59, -1e+30 }
 0x4e8   : > { %v3969_v26 = vpop.f32.mrf.mxu0 }
 0x4e9   : > { %v4127_v17 = vsel %vm796_vm3, %v3969_v26, -1e+30 }
 0x4ea   : > { %v3971_v63 = vpop.f32.mrf.mxu0 }
 0x4eb   : > { %v4133_v40 = vsel %vm796_vm3, %v3971_v63, -1e+30 }
 0x4ec   : > { %v3973_v21 = vpop.f32.mrf.mxu0 }
 0x4ed   : > { %v4151_v26 = vsel %vm796_vm3, %v3973_v21, -1e+30 }
 0x4ee   : > { %v2714_v44 = vpop.f32.mrf.mxu0 }
 0x4ef   : > { %v4061_v11 = vsel %vm796_vm3, %v2714_v44, -1e+30 }
 0x4f0   : > { %v3975_v12 = vpop.f32.mrf.mxu0 }
 0x4f1   : > { %v4082_v31 = vsel %vm796_vm3, %v3975_v12, -1e+30 }
 0x4f2   : > { %v3977_v0 = vpop.f32.mrf.mxu0 }
 0x4f3   : > { %v4088_v32 = vsel %vm796_vm3, %v3977_v0, -1e+30 }
 0x4f4   : > { %v3979_v15 = vpop.f32.mrf.mxu0 }
 0x4f5   : > { %v4110_v58 = vsel %vm796_vm3, %v3979_v15, -1e+30 }
 0x4f6   : > { %v2718_v53 = vpop.f32.mrf.mxu0  ;;  %v3981_v57 = vpop.f32.mrf.mxu1 }
 0x4f7   : > { %v4021_v5 = vsel %vm796_vm3, %v2718_v53, -1e+30  ;;  %v4116_v29 = vsel %vm796_vm3, %v3981_v57, -1e+30 }
 0x4f8   : > { %v1617_v13 = vpop.f32.mrf.mxu0  ;;  %v3983_v14 = vpop.f32.mrf.mxu1 }
 0x4f9   : > { %v4041_v4 = vsel %vm796_vm3, %v1617_v13, -1e+30  ;;  %v4139_v55 = vsel %vm796_vm3, %v3983_v14, -1e+30 }
 0x4fa   : > { %v2719_v49 = vpop.f32.mrf.mxu0  ;;  %v3985_v52 = vpop.f32.mrf.mxu1 }
 0x4fb   : > { %v4046_v62 = vsel %vm796_vm3, %v2719_v49, -1e+30  ;;  %v4145_v59 = vsel %vm796_vm3, %v3985_v52, -1e+30 }
 0x4fc   : > { %v1620_v16 = vpop.f32.mrf.mxu0  ;;  %v3987_v3 = vpop.f32.mrf.mxu1 }
 0x4fd   : > { %v4066_v35 = vsel %vm796_vm3, %v1620_v16, -1e+30  ;;  %v4157_v63 = vsel %vm796_vm3, %v3987_v3, -1e+30 }
 0x4fe   : > { %v2722_v61 = vpop.f32.mrf.mxu0  ;;  %v2752_v33 = vpop.f32.mrf.mxu1 }
 0x4ff   : > { %v3991_v47 = vsel %vm796_vm3, %v2722_v61, -1e+30  ;;  %v4071_v18 = vsel %vm796_vm3, %v2752_v33, -1e+30 }
 0x500   : > { %1692 = vmax.xlane.f32.xlu0 %v3991_v47  ;;  %v1633_v1 = vpop.f32.mrf.mxu0  ;;  %v1953_v22 = vpop.f32.mrf.mxu1 }
 0x501   : > { %v4001_v42 = vsel %vm796_vm3, %v1633_v1, -1e+30  ;;  %v4093_v7 = vsel %vm796_vm3, %v1953_v22, -1e+30 }
 0x502   : > { %v2723_v10 = vpop.f32.mrf.mxu0  ;;  %v2753_v34 = vpop.f32.mrf.mxu1 }
 0x503   : > { %v3996_v30 = vsel %vm796_vm3, %v2723_v10, -1e+30  ;;  %v4098_v24 = vsel %vm796_vm3, %v2753_v34, -1e+30 }
 0x504   : > { %1694 = vmax.xlane.f32.xlu1 %v3996_v30  ;;  %v1956_v27 = vpop.f32.mrf.mxu1  ;;  %v1636_v60 = vpop.f32.mrf.mxu0 }
 0x505   : > { %v4026_v56 = vsel %vm796_vm3, %v1636_v60, -1e+30  ;;  %v4121_v9 = vsel %vm796_vm3, %v1956_v27, -1e+30 }
 0x506   : > { %v2756_v51 = vpop.f32.mrf.mxu1 }
 0x507   : > { %v4031_v50 = vsel %vm796_vm3, %v2756_v51, -1e+30 }
 0x508   : > { %1688 = vmax.xlane.f32.xlu1 %v4001_v42  ;;  %v1969_v48 = vpop.f32.mrf.mxu1 }
 0x509   : > { %v4051_v28 = vsel %vm796_vm3, %v1969_v48, -1e+30 }
 0x50a   : > { %v2757_v23 = vpop.f32.mrf.mxu1 }
 0x50b   : > { %v4056_v19 = vsel %vm796_vm3, %v2757_v23, -1e+30 }
 0x50c   : > { %v1972_v2 = vpop.f32.mrf.mxu1 }
 0x50d   : > { %v4076_v39 = vsel %vm796_vm3, %v1972_v2, -1e+30 }
 0x50e   : > { %v2760_v25 = vpop.f32.mrf.mxu1 }
 0x50f   : > { %v4006_v41 = vsel %vm796_vm3, %v2760_v25, -1e+30 }
 0x510   : > { %v1985_v36 = vpop.f32.mrf.mxu1  ;;  %2044 = vmax.xlane.f32.xlu0 %v4006_v41 }
 0x511   : > { %v4011_v8 = vsel %vm796_vm3, %v1985_v36, -1e+30 }
 0x512   : > { %v2761_v54 = vpop.f32.mrf.mxu1  ;;  %2040 = vmax.xlane.f32.xlu1 %v4011_v8 }
 0x513   : > { %v4016_v6 = vsel %vm796_vm3, %v2761_v54, -1e+30 }
 0x514   : > { %2046 = vmax.xlane.f32.xlu0 %v4016_v6  ;;  %v1988_v38 = vpop.f32.mrf.mxu1 }
 0x515   : > { %v4036_v43 = vsel %vm796_vm3, %v1988_v38, -1e+30 }
 0x516   : > { %1684 = vmax.xlane.f32.xlu1 %v4021_v5 }
 0x518   : > { %1690 = vmax.xlane.f32.xlu0 %v4026_v56 }
 0x51a   : > { %2036 = vmax.xlane.f32.xlu1 %v4031_v50 }
 0x51c   : > { %2042 = vmax.xlane.f32.xlu0 %v4036_v43 }
 0x51e   : > { %1680 = vmax.xlane.f32.xlu1 %v4041_v4 }
 0x520   : > { %1686 = vmax.xlane.f32.xlu0 %v4046_v62 }
 0x522   : > { %2032 = vmax.xlane.f32.xlu1 %v4051_v28 }
 0x524   : > { %2038 = vmax.xlane.f32.xlu0 %v4056_v19 }
 0x526   : > { %1676 = vmax.xlane.f32.xlu1 %v4061_v11 }
 0x528   : > { %1682 = vmax.xlane.f32.xlu0 %v4066_v35 }
 0x52a   : > { %2028 = vmax.xlane.f32.xlu1 %v4071_v18 }
 0x52c   : > { %2034 = vmax.xlane.f32.xlu0 %v4076_v39 }
 0x52e   : > { %1672 = vmax.xlane.f32.xlu1 %v4082_v31 }
 0x530   : > { %1678 = vmax.xlane.f32.xlu0 %v4088_v32 }
 0x532   : > { %2024 = vmax.xlane.f32.xlu1 %v4093_v7 }
 0x534   : > { %2030 = vmax.xlane.f32.xlu0 %v4098_v24 }
 0x536   : > { %1668 = vmax.xlane.f32.xlu1 %v4104_v45 }
 0x538   : > { %1674 = vmax.xlane.f32.xlu0 %v4110_v58 }
 0x53a   : > { %2020 = vmax.xlane.f32.xlu1 %v4116_v29 }
 0x53c   : > { %2026 = vmax.xlane.f32.xlu0 %v4121_v9 }
 0x53e   : > { %1664 = vmax.xlane.f32.xlu1 %v4127_v17 }
 0x540   : > { %1670 = vmax.xlane.f32.xlu0 %v4133_v40 }
 0x542   : > { %2016 = vmax.xlane.f32.xlu1 %v4139_v55 }
 0x544   : > { %2022 = vmax.xlane.f32.xlu0 %v4145_v59 }
 0x548   : > { %1666 = vmax.xlane.f32.xlu0 %v4151_v26 }
 0x54c   : > { %2018 = vmax.xlane.f32.xlu0 %v4157_v63 }
 0x589   : > { %v1693_v44 = vpop.xlane.xlu0 %1692 }
 0x58a   : > { %v1710_v12 = vsub.f32 %v3991_v47, %v1693_v44 }
 0x58c   : > { %v1740_v0 = vmul.f32 1.442695, %v1710_v12 }
 0x58d   : > { %v1695_v15 = vpop.xlane.xlu1 %1694 }
 0x58e   : > { %3011 = vpow2.f32 %v1740_v0  ;;  %v1711_v53 = vsub.f32 %v3996_v30, %v1695_v15 }
 0x590   : > { %v1742_v57 = vmul.f32 1.442695, %v1711_v53 }
 0x591   : > { %v1689_v21 = vpop.xlane.xlu1 %1688 }
 0x592   : > { %3013 = vpow2.f32 %v1742_v57  ;;  %v1708_v13 = vsub.f32 %v4001_v42, %v1689_v21 }
 0x594   : > { %v1736_v14 = vmul.f32 1.442695, %v1708_v13 }
 0x596   : > { %3015 = vpow2.f32 %v1736_v14 }
 0x599   : > { %v2045_v49 = vpop.xlane.xlu0 %2044 }
 0x59a   : > { %v2062_v16 = vsub.f32 %v4006_v41, %v2045_v49 }
 0x59b   : > { %v4163_v52 = vpop.eup %3011  ;;  %v2041_v3 = vpop.xlane.xlu1 %2040 }
 0x59c   : > { %1772 = vadd.xlane.f32.xlu1 %v4163_v52  ;;  %v2092_v61 = vmul.f32 1.442695, %v2062_v16  ;;  %v2060_v20 = vsub.f32 %v4011_v8, %v2041_v3 }
 0x59d   : > { %v2047_v47 = vpop.xlane.xlu0 %2046 }
 0x59e   : > { %3017 = vpow2.f32 %v2092_v61  ;;  %v2088_v1 = vmul.f32 1.442695, %v2060_v20  ;;  %v2063_v22 = vsub.f32 %v4016_v6, %v2047_v47 }
 0x59f   : > { %v4168_v33 = vpop.eup %3013  ;;  %v1685_v10 = vpop.xlane.xlu1 %1684 }
 0x5a0   : > { %1774 = vadd.xlane.f32.xlu0 %v4168_v33  ;;  %v2094_v30 = vmul.f32 1.442695, %v2063_v22  ;;  %v1706_v34 = vsub.f32 %v4021_v5, %v1685_v10  ;;  %3019 = vpow2.f32 %v2088_v1 }
 0x5a1   : > { %v1691_v42 = vpop.xlane.xlu0 %1690 }
 0x5a2   : > { %3021 = vpow2.f32 %v2094_v30  ;;  %v1732_v51 = vmul.f32 1.442695, %v1706_v34  ;;  %v1709_v48 = vsub.f32 %v4026_v56, %v1691_v42 }
 0x5a3   : > { %v4173_v27 = vpop.eup %3015  ;;  %v2037_v23 = vpop.xlane.xlu1 %2036 }
 0x5a4   : > { %1768 = vadd.xlane.f32.xlu1 %v4173_v27  ;;  %v1738_v2 = vmul.f32 1.442695, %v1709_v48  ;;  %v2058_v25 = vsub.f32 %v4031_v50, %v2037_v23  ;;  %3023 = vpow2.f32 %v1732_v51 }
 0x5a5   : > { %v2043_v41 = vpop.xlane.xlu0 %2042 }
 0x5a6   : > { %3025 = vpow2.f32 %v1738_v2  ;;  %v2084_v36 = vmul.f32 1.442695, %v2058_v25  ;;  %v2061_v8 = vsub.f32 %v4036_v43, %v2043_v41 }
 0x5a7   : > { %v1681_v54 = vpop.xlane.xlu1 %1680 }
 0x5a8   : > { %v2090_v6 = vmul.f32 1.442695, %v2061_v8  ;;  %v1704_v60 = vsub.f32 %v4041_v4, %v1681_v54  ;;  %3027 = vpow2.f32 %v2084_v36 }
 0x5a9   : > { %v1687_v5 = vpop.xlane.xlu0 %1686 }
 0x5aa   : > { %3029 = vpow2.f32 %v2090_v6  ;;  %v1728_v56 = vmul.f32 1.442695, %v1704_v60  ;;  %v1707_v38 = vsub.f32 %v4046_v62, %v1687_v5 }
 0x5ab   : > { %v4181_v44 = vpop.eup %3017  ;;  %v2033_v12 = vpop.xlane.xlu1 %2032 }
 0x5ac   : > { %v1734_v50 = vmul.f32 1.442695, %v1707_v38  ;;  %v2056_v0 = vsub.f32 %v4051_v28, %v2033_v12  ;;  %2124 = vadd.xlane.f32.xlu1 %v4181_v44  ;;  %3031 = vpow2.f32 %v1728_v56 }
 0x5ad   : > { %v2039_v43 = vpop.xlane.xlu0 %2038  ;;  %v4185_v15 = vpop.eup %3019 }
 0x5ae   : > { %3033 = vpow2.f32 %v1734_v50  ;;  %v2080_v4 = vmul.f32 1.442695, %v2056_v0  ;;  %v2059_v53 = vsub.f32 %v4056_v19, %v2039_v43 }
 0x5af   : > { %v4188_v57 = vpop.eup %3021  ;;  %v1677_v21 = vpop.xlane.xlu1 %1676 }
 0x5b0   : > { %v2086_v62 = vmul.f32 1.442695, %v2059_v53  ;;  %v1702_v13 = vsub.f32 %v4061_v11, %v1677_v21  ;;  %2120 = vadd.xlane.f32.xlu1 %v4185_v15  ;;  %2126 = vadd.xlane.f32.xlu0 %v4188_v57  ;;  %3035 = vpow2.f32 %v2080_v4 }
 0x5b1   : > { %v1683_v28 = vpop.xlane.xlu0 %1682  ;;  %v4193_v14 = vpop.eup %3023 }
 0x5b2   : > { %3037 = vpow2.f32 %v2086_v62  ;;  %v1724_v49 = vmul.f32 1.442695, %v1702_v13  ;;  %v1705_v16 = vsub.f32 %v4066_v35, %v1683_v28 }
 0x5b3   : > { %v4196_v3 = vpop.eup %3025  ;;  %v2029_v19 = vpop.xlane.xlu1 %2028 }
 0x5b4   : > { %v1730_v61 = vmul.f32 1.442695, %v1705_v16  ;;  %v2054_v20 = vsub.f32 %v4071_v18, %v2029_v19  ;;  %1764 = vadd.xlane.f32.xlu1 %v4193_v14  ;;  %1770 = vadd.xlane.f32.xlu0 %v4196_v3  ;;  %3039 = vpow2.f32 %v1724_v49 }
 0x5b5   : > { %v2035_v11 = vpop.xlane.xlu0 %2034  ;;  %v4201_v47 = vpop.eup %3027 }
 0x5b6   : > { %3041 = vpow2.f32 %v1730_v61  ;;  %v2076_v1 = vmul.f32 1.442695, %v2054_v20  ;;  %v2057_v22 = vsub.f32 %v4076_v39, %v2035_v11 }
 0x5b7   : > { %v4204_v10 = vpop.eup %3029  ;;  %v1673_v35 = vpop.xlane.xlu1 %1672 }
 0x5b8   : > { %v2082_v30 = vmul.f32 1.442695, %v2057_v22  ;;  %v1700_v34 = vsub.f32 %v4082_v31, %v1673_v35  ;;  %2116 = vadd.xlane.f32.xlu1 %v4201_v47  ;;  %2122 = vadd.xlane.f32.xlu0 %v4204_v10  ;;  %3043 = vpow2.f32 %v2076_v1 }
 0x5b9   : > { %v1679_v18 = vpop.xlane.xlu0 %1678  ;;  %v4209_v42 = vpop.eup %3031 }
 0x5ba   : > { %3045 = vpow2.f32 %v2082_v30  ;;  %v1720_v51 = vmul.f32 1.442695, %v1700_v34  ;;  %v1703_v48 = vsub.f32 %v4088_v32, %v1679_v18 }
 0x5bb   : > { %v4212_v23 = vpop.eup %3033  ;;  %v2025_v39 = vpop.xlane.xlu1 %2024 }
 0x5bc   : > { %v1726_v2 = vmul.f32 1.442695, %v1703_v48  ;;  %v2052_v25 = vsub.f32 %v4093_v7, %v2025_v39  ;;  %1760 = vadd.xlane.f32.xlu1 %v4209_v42  ;;  %1766 = vadd.xlane.f32.xlu0 %v4212_v23  ;;  %3047 = vpow2.f32 %v1720_v51 }
 0x5bd   : > { %v2031_v31 = vpop.xlane.xlu0 %2030  ;;  %v4217_v41 = vpop.eup %3035 }
 0x5be   : > { %3049 = vpow2.f32 %v1726_v2  ;;  %v2072_v36 = vmul.f32 1.442695, %v2052_v25  ;;  %v2055_v8 = vsub.f32 %v4098_v24, %v2031_v31 }
 0x5bf   : > { %v4220_v54 = vpop.eup %3037  ;;  %v1669_v32 = vpop.xlane.xlu1 %1668 }
 0x5c0   : > { %v2078_v6 = vmul.f32 1.442695, %v2055_v8  ;;  %v1698_v60 = vsub.f32 %v4104_v45, %v1669_v32  ;;  %2112 = vadd.xlane.f32.xlu1 %v4217_v41  ;;  %2118 = vadd.xlane.f32.xlu0 %v4220_v54  ;;  %3051 = vpow2.f32 %v2072_v36 }
 0x5c1   : > { %v1675_v7 = vpop.xlane.xlu0 %1674  ;;  %v4225_v5 = vpop.eup %3039 }
 0x5c2   : > { %3053 = vpow2.f32 %v2078_v6  ;;  %v1716_v56 = vmul.f32 1.442695, %v1698_v60  ;;  %v1701_v38 = vsub.f32 %v4110_v58, %v1675_v7  ;;  %v695_v6 = vld [vmem:[%s4420_s8 + $0x10] sm:$0xff]  ;;  %v2219_v60 = vld [vmem:[%s4422_s10] sm:$0xff]  ;;  %v2220_v7 = vld [vmem:[%s4422_s10 + $0x8] sm:$0xff] }
 0x5c3   : > { %v4228_v12 = vpop.eup %3041  ;;  %v2021_v24 = vpop.xlane.xlu1 %2020 }
 0x5c4   : > { %v1722_v50 = vmul.f32 1.442695, %v1701_v38  ;;  %v2050_v0 = vsub.f32 %v4116_v29, %v2021_v24  ;;  %1756 = vadd.xlane.f32.xlu1 %v4225_v5  ;;  %1762 = vadd.xlane.f32.xlu0 %v4228_v12  ;;  %3055 = vpow2.f32 %v1716_v56  ;;  %v2222_v56 = vld [vmem:[%s4422_s10 + $0x18] sm:$0xff]  ;;  %v2221_v24 = vld [vmem:[%s4422_s10 + $0x10] sm:$0xff] }
 0x5c5   : > { %v2027_v45 = vpop.xlane.xlu0 %2026  ;;  %v4233_v43 = vpop.eup %3043  ;;  %v696_v38 = vld [vmem:[%s4420_s8 + $0x18] sm:$0xff] }
 0x5c6   : > { %3057 = vpow2.f32 %v1722_v50  ;;  %v2068_v4 = vmul.f32 1.442695, %v2050_v0  ;;  %v2053_v53 = vsub.f32 %v4121_v9, %v2027_v45 }
 0x5c7   : > { %v4236_v21 = vpop.eup %3045  ;;  %v1665_v58 = vpop.xlane.xlu1 %1664 }
 0x5c8   : > { %v2074_v62 = vmul.f32 1.442695, %v2053_v53  ;;  %v1696_v13 = vsub.f32 %v4127_v17, %v1665_v58  ;;  %2108 = vadd.xlane.f32.xlu1 %v4233_v43  ;;  %2114 = vadd.xlane.f32.xlu0 %v4236_v21  ;;  %3059 = vpow2.f32 %v2068_v4 }
 0x5c9   : > { %v1671_v29 = vpop.xlane.xlu0 %1670  ;;  %v4241_v28 = vpop.eup %3047 }
 0x5ca   : > { %3061 = vpow2.f32 %v2074_v62  ;;  %v1712_v49 = vmul.f32 1.442695, %v1696_v13  ;;  %v1699_v16 = vsub.f32 %v4133_v40, %v1671_v29 }
 0x5cb   : > { %v4244_v19 = vpop.eup %3049  ;;  %v2017_v9 = vpop.xlane.xlu1 %2016 }
 0x5cc   : > { %v1718_v61 = vmul.f32 1.442695, %v1699_v16  ;;  %v2048_v20 = vsub.f32 %v4139_v55, %v2017_v9  ;;  %1752 = vadd.xlane.f32.xlu1 %v4241_v28  ;;  %1758 = vadd.xlane.f32.xlu0 %v4244_v19  ;;  %3063 = vpow2.f32 %v1712_v49 }
 0x5cd   : > { %v2023_v17 = vpop.xlane.xlu0 %2022  ;;  %v4249_v11 = vpop.eup %3051 }
 0x5ce   : > { %3065 = vpow2.f32 %v1718_v61  ;;  %v2064_v1 = vmul.f32 1.442695, %v2048_v20  ;;  %v2051_v22 = vsub.f32 %v4145_v59, %v2023_v17 }
 0x5cf   : > { %v4252_v35 = vpop.eup %3053 }
 0x5d0   : > { %v2070_v40 = vmul.f32 1.442695, %v2051_v22  ;;  %2104 = vadd.xlane.f32.xlu1 %v4249_v11  ;;  %2110 = vadd.xlane.f32.xlu0 %v4252_v35  ;;  %3067 = vpow2.f32 %v2064_v1 }
 0x5d1   : > { %v1667_v55 = vpop.xlane.xlu0 %1666  ;;  %v4256_v30 = vpop.eup %3055 }
 0x5d2   : > { %3069 = vpow2.f32 %v2070_v40  ;;  %v1697_v34 = vsub.f32 %v4151_v26, %v1667_v55 }
 0x5d3   : > { %v4259_v18 = vpop.eup %3057 }
 0x5d4   : > { %v1714_v51 = vmul.f32 1.442695, %v1697_v34  ;;  %1748 = vadd.xlane.f32.xlu1 %v4256_v30  ;;  %1754 = vadd.xlane.f32.xlu0 %v4259_v18 }
 0x5d5   : > { %v2019_v59 = vpop.xlane.xlu0 %2018  ;;  %v4263_v48 = vpop.eup %3059 }
 0x5d6   : > { %3071 = vpow2.f32 %v1714_v51  ;;  %v2049_v39 = vsub.f32 %v4157_v63, %v2019_v59 }
 0x5d7   : > { %v4266_v2 = vpop.eup %3061 }
 0x5d8   : > { %v2066_v25 = vmul.f32 1.442695, %v2049_v39  ;;  %2100 = vadd.xlane.f32.xlu1 %v4263_v48  ;;  %2106 = vadd.xlane.f32.xlu0 %v4266_v2 }
 0x5d9   : > { %v4270_v26 = vpop.eup %3063 }
 0x5da   : > { %3073 = vpow2.f32 %v2066_v25 }
 0x5db   : > { %v4272_v31 = vpop.eup %3065 }
 0x5dc   : > { %1744 = vadd.xlane.f32.xlu1 %v4270_v26  ;;  %1750 = vadd.xlane.f32.xlu0 %v4272_v31 }
 0x5dd   : > { %v4276_v36 = vpop.eup %3067 }
 0x5df   : > { %v4278_v8 = vpop.eup %3069 }
 0x5e0   : > { %2096 = vadd.xlane.f32.xlu1 %v4276_v36  ;;  %2102 = vadd.xlane.f32.xlu0 %v4278_v8 }
 0x5e3   : > { %v4282_v63 = vpop.eup %3071 }
 0x5e4   : > { %1746 = vadd.xlane.f32.xlu0 %v4282_v63 }
 0x5e7   : > { %v4285_v32 = vpop.eup %3073 }
 0x5e8   : > { %2098 = vadd.xlane.f32.xlu0 %v4285_v32 }
 0x5f1   : > { %709 = vperm.xlu1 %2868, %v695_v6  }
 0x5f5   : > { %2225 = vperm.xlu1 %2868, %v2219_v60  }
 0x5f9   : > { %2230 = vperm.xlu1 %2868, %v2220_v7  }
 0x5fd   : > { %2240 = vperm.xlu1 %2868, %v2222_v56  }
 0x5fe   : > { %714 = vperm.xlu0 %2867, %v696_v38  }
 0x602   : > { %2235 = vperm.xlu0 %2867, %v2221_v24  }
 0x625   : > { %v1773_v50 = vpop.xlane.xlu1 %1772 }
 0x626   : > { %3075 = vrcp.f32 %v1773_v50 }
 0x629   : > { %v1775_v0 = vpop.xlane.xlu0 %1774 }
 0x62a   : > { %3077 = vrcp.f32 %v1775_v0 }
 0x62d   : > { %v1769_v45 = vpop.xlane.xlu1 %1768 }
 0x633   : > { %v3076_v4 = vpop.eup %3075 }
 0x634   : > { %v1806_v62 = vmul.f32 %v3076_v4, %v4163_v52 }
 0x635   : > { %v2125_v53 = vpop.xlane.xlu1 %2124 }
 0x636   : > { %3079 = vrcp.f32 %v2125_v53 }
 0x637   : > { %v3078_v58 = vpop.eup %3077 }
 0x638   : > { %v1807_v13 = vmul.f32 %v3078_v58, %v4168_v33 }
 0x639   : > { %v2121_v29 = vpop.xlane.xlu1 %2120  ;;  %v2127_v49 = vpop.xlane.xlu0 %2126 }
 0x63a   : > { %v1815_v16 = vpack.c.bf16 %v1807_v13, %v1806_v62  ;;  %3081 = vrcp.f32 %v2127_v49 }
 0x63b   : > { %3083 = vrcp.f32 %v1769_v45 }
 0x63c   : > { %2725 = vmatpush3.bf16.xpose.msra.mxu0 %v1815_v16 }
 0x63d   : > { %2726 = vmatprep.subr.bf16.mxu0 %v4465_v37  ;;  %v1765_v9 = vpop.xlane.xlu1 %1764  ;;  %v1771_v61 = vpop.xlane.xlu0 %1770 }
 0x63e   : > { %3085 = vrcp.f32 %v1771_v61 }
 0x63f   : > { %3087 = vrcp.f32 %v2121_v29 }
 0x641   : > { %v2117_v20 = vpop.xlane.xlu1 %2116  ;;  %v2123_v17 = vpop.xlane.xlu0 %2122 }
 0x642   : > { %3089 = vrcp.f32 %v2123_v17 }
 0x643   : > { %3091 = vrcp.f32 %v1765_v9  ;;  %v3080_v33 = vpop.eup %3079 }
 0x644   : > { %v2158_v34 = vmul.f32 %v3080_v33, %v4181_v44 }
 0x645   : > { %v1761_v52 = vpop.xlane.xlu1 %1760  ;;  %v1767_v1 = vpop.xlane.xlu0 %1766 }
 0x646   : > { %3093 = vrcp.f32 %v1767_v1 }
 0x647   : > { %v3082_v22 = vpop.eup %3081  ;;  %3095 = vrcp.f32 %v2117_v20 }
 0x648   : > { %v2159_v51 = vmul.f32 %v3082_v22, %v4188_v57  ;;  %v3084_v59 = vpop.eup %3083 }
 0x649   : > { %v2113_v40 = vpop.xlane.xlu1 %2112  ;;  %v2119_v55 = vpop.xlane.xlu0 %2118  ;;  %v1804_v7 = vmul.f32 %v3084_v59, %v4173_v27 }
 0x64a   : > { %3097 = vrcp.f32 %v2119_v55  ;;  %v2167_v39 = vpack.c.bf16 %v2159_v51, %v2158_v34 }
 0x64b   : > { %v3086_v25 = vpop.eup %3085  ;;  %3099 = vrcp.f32 %v1761_v52 }
 0x64c   : > { %2763 = vmatpush3.bf16.xpose.msra.mxu1 %v2167_v39  ;;  %v1805_v56 = vmul.f32 %v3086_v25, %v4196_v3  ;;  %v3088_v38 = vpop.eup %3087 }
 0x64d   : > { %v1757_v6 = vpop.xlane.xlu1 %1756  ;;  %v1763_v60 = vpop.xlane.xlu0 %1762  ;;  %2764 = vmatprep.subr.bf16.mxu1 %v4465_v37  ;;  %v2156_v0 = vmul.f32 %v3088_v38, %v4185_v15 }
 0x64e   : > { %3101 = vrcp.f32 %v1763_v60  ;;  %v1814_v24 = vpack.c.bf16 %v1805_v56, %v1804_v7 }
 0x64f   : > { %v3090_v44 = vpop.eup %3089  ;;  %3103 = vrcp.f32 %v2113_v40 }
 0x650   : > { %2727 = vmatpush3.bf16.xpose.msra.mxu0 %v1814_v24  ;;  %v2157_v45 = vmul.f32 %v3090_v44, %v4204_v10  ;;  %v3092_v4 = vpop.eup %3091 }
 0x651   : > { %v2109_v57 = vpop.xlane.xlu1 %2108  ;;  %v2115_v50 = vpop.xlane.xlu0 %2114  ;;  %2728 = vmatprep.subr.bf16.mxu0 %v4465_v37  ;;  %v1802_v62 = vmul.f32 %v3092_v4, %v4193_v14 }
 0x652   : > { %3105 = vrcp.f32 %v2115_v50  ;;  %v2166_v27 = vpack.c.bf16 %v2157_v45, %v2156_v0 }
 0x653   : > { %v3094_v3 = vpop.eup %3093  ;;  %3107 = vrcp.f32 %v1757_v6 }
 0x654   : > { %2765 = vmatpush3.bf16.xpose.msra.mxu1 %v2166_v27  ;;  %v1803_v13 = vmul.f32 %v3094_v3, %v4212_v23  ;;  %v3096_v29 = vpop.eup %3095 }
 0x655   : > { %v1753_v53 = vpop.xlane.xlu1 %1752  ;;  %v1759_v58 = vpop.xlane.xlu0 %1758  ;;  %2766 = vmatprep.subr.bf16.mxu1 %v4465_v37  ;;  %v2154_v9 = vmul.f32 %v3096_v29, %v4201_v47 }
 0x656   : > { %3109 = vrcp.f32 %v1759_v58  ;;  %v1813_v15 = vpack.c.bf16 %v1803_v13, %v1802_v62 }
 0x657   : > { %v3098_v10 = vpop.eup %3097  ;;  %3111 = vrcp.f32 %v2109_v57 }
 0x658   : > { %2729 = vmatpush3.bf16.xpose.msra.mxu0 %v1813_v15  ;;  %v2155_v61 = vmul.f32 %v3098_v10, %v4220_v54  ;;  %v3100_v20 = vpop.eup %3099 }
 0x659   : > { %v2105_v49 = vpop.xlane.xlu1 %2104  ;;  %v2111_v16 = vpop.xlane.xlu0 %2110  ;;  %2730 = vmatprep.subr.bf16.mxu0 %v4465_v37  ;;  %v1800_v1 = vmul.f32 %v3100_v20, %v4209_v42 }
 0x65a   : > { %3113 = vrcp.f32 %v2111_v16  ;;  %v2165_v14 = vpack.c.bf16 %v2155_v61, %v2154_v9 }
 0x65b   : > { %v3102_v23 = vpop.eup %3101  ;;  %3115 = vrcp.f32 %v1753_v53 }
 0x65c   : > { %2767 = vmatpush3.bf16.xpose.msra.mxu1 %v2165_v14  ;;  %v1801_v33 = vmul.f32 %v3102_v23, %v4228_v12  ;;  %v3104_v22 = vpop.eup %3103 }
 0x65d   : > { %v1749_v17 = vpop.xlane.xlu1 %1748  ;;  %v1755_v52 = vpop.xlane.xlu0 %1754  ;;  %2768 = vmatprep.subr.bf16.mxu1 %v4465_v37  ;;  %v2152_v34 = vmul.f32 %v3104_v22, %v4217_v41  ;;  %v4475_v22 = vld [vmem:[#allocation15_spill] sm:$0xff] }
 0x65e   : > { %3117 = vrcp.f32 %v1755_v52  ;;  %v1812_v47 = vpack.c.bf16 %v1801_v33, %v1800_v1 }
 0x65f   : > { %v3106_v54 = vpop.eup %3105  ;;  %3119 = vrcp.f32 %v2105_v49 }
 0x660   : > { %2731 = vmatpush3.bf16.xpose.msra.mxu0 %v1812_v47  ;;  %v2153_v51 = vmul.f32 %v3106_v54, %v4236_v21  ;;  %v3108_v59 = vpop.eup %3107  ;;  %v2881_v54 = vld [vmem:[#allocation3] sm:$0xff]  }
 0x661   : > { %v2101_v40 = vpop.xlane.xlu1 %2100  ;;  %v2107_v55 = vpop.xlane.xlu0 %2106  ;;  %2732 = vmatprep.subr.bf16.mxu0 %v4465_v37  ;;  %v1798_v25 = vmul.f32 %v3108_v59, %v4225_v5 }
 0x662   : > { %3121 = vrcp.f32 %v2107_v55  ;;  %v2164_v42 = vpack.c.bf16 %v2153_v51, %v2152_v34 }
 0x663   : > { %v3110_v12 = vpop.eup %3109  ;;  %3123 = vrcp.f32 %v1749_v17 }
 0x664   : > { %2769 = vmatpush3.bf16.xpose.msra.mxu1 %v2164_v42  ;;  %v1799_v6 = vmul.f32 %v3110_v12, %v4244_v19  ;;  %v3112_v60 = vpop.eup %3111  ;;  %v2882_v12 = vld [vmem:[#allocation3 + $0x8] sm:$0xff]  }
 0x665   : > { %v1751_v39 = vpop.xlane.xlu0 %1750  ;;  %2770 = vmatprep.subr.bf16.mxu1 %v4465_v37  ;;  %v1745_v7 = vpop.xlane.xlu1 %1744  ;;  %v2150_v38 = vmul.f32 %v3112_v60, %v4233_v43 }
 0x666   : > { %3125 = vrcp.f32 %v1751_v39  ;;  %v1811_v41 = vpack.c.bf16 %v1799_v6, %v1798_v25 }
 0x667   : > { %v3114_v21 = vpop.eup %3113  ;;  %3127 = vrcp.f32 %v2101_v40 }
 0x668   : > { %2733 = vmatpush3.bf16.xpose.msra.mxu0 %v1811_v41  ;;  %v2151_v24 = vmul.f32 %v3114_v21, %v4252_v35  ;;  %v3116_v44 = vpop.eup %3115 }
 0x669   : > { %v2103_v56 = vpop.xlane.xlu0 %2102  ;;  %2734 = vmatprep.subr.bf16.mxu0 %v4465_v37  ;;  %v2097_v57 = vpop.xlane.xlu1 %2096  ;;  %v1796_v0 = vmul.f32 %v3116_v44, %v4241_v28 }
 0x66a   : > { %3129 = vrcp.f32 %v2103_v56  ;;  %v2163_v5 = vpack.c.bf16 %v2151_v24, %v2150_v38 }
 0x66b   : > { %v3118_v19 = vpop.eup %3117  ;;  %3131 = vrcp.f32 %v1745_v7 }
 0x66c   : > { %2771 = vmatpush3.bf16.xpose.msra.mxu1 %v2163_v5  ;;  %v1797_v45 = vmul.f32 %v3118_v19, %v4259_v18  ;;  %v3120_v4 = vpop.eup %3119 }
 0x66d   : > { %v1747_v50 = vpop.xlane.xlu0 %1746  ;;  %2772 = vmatprep.subr.bf16.mxu1 %v4465_v37  ;;  %v2148_v3 = vmul.f32 %v3120_v4, %v4249_v11  ;;  %v710_v23 = vpop.permute.xlu1 %709 }
 0x66e   : > { %3133 = vrcp.f32 %v1747_v50  ;;  %v1810_v43 = vpack.c.bf16 %v1797_v45, %v1796_v0 }
 0x66f   : > { %v3122_v35 = vpop.eup %3121  ;;  %3135 = vrcp.f32 %v2097_v57 }
 0x670   : > { %2735 = vmatpush3.bf16.xpose.msra.mxu0 %v1810_v43  ;;  %v2149_v53 = vmul.f32 %v3122_v35, %v4266_v2  ;;  %v3124_v58 = vpop.eup %3123 }
 0x671   : > { %v2099_v27 = vpop.xlane.xlu0 %2098  ;;  %2736 = vmatprep.subr.bf16.mxu0 %v4465_v37  ;;  %v1794_v18 = vmul.f32 %v3124_v58, %v4256_v30  ;;  %v2226_v39 = vpop.permute.xlu1 %2225 }
 0x672   : > { %3137 = vrcp.f32 %v2099_v27  ;;  %v2162_v28 = vpack.c.bf16 %v2149_v53, %v2148_v3 }
 0x673   : > { %v3126_v62 = vpop.eup %3125 }
 0x674   : > { %2773 = vmatpush3.bf16.xpose.msra.mxu1 %v2162_v28  ;;  %v1795_v13 = vmul.f32 %v3126_v62, %v4272_v31  ;;  %v3128_v29 = vpop.eup %3127 }
 0x675   : > { %2774 = vmatprep.subr.bf16.mxu1 %v4465_v37  ;;  %v2146_v11 = vmul.f32 %v3128_v29, %v4263_v48  ;;  %v2231_v25 = vpop.permute.xlu1 %2230 }
 0x676   : > { %v1809_v15 = vpack.c.bf16 %v1795_v13, %v1794_v18 }
 0x677   : > { %v3130_v10 = vpop.eup %3129 }
 0x678   : > { %v3132_v49 = vpop.eup %3131  ;;  %2737 = vmatpush3.bf16.xpose.msra.mxu0 %v1809_v15  ;;  %v2147_v2 = vmul.f32 %v3130_v10, %v4278_v8  ;;  %v4474_v8 = vld [vmem:[#allocation13_spill] sm:$0xff] }
 0x679   : > { %2738 = vmatprep.subr.bf16.mxu0 %v4465_v37  ;;  %v1792_v61 = vmul.f32 %v3132_v49, %v4270_v26  ;;  %v788_v52 = vadd.f32 %v4474_v8, %v710_v23  ;;  %v715_v33 = vpop.permute.xlu0 %714  ;;  %v2241_v56 = vpop.permute.xlu1 %2240 }
 0x67a   : > { %v2161_v9 = vpack.c.bf16 %v2147_v2, %v2146_v11 }
 0x67b   : > { %v3134_v16 = vpop.eup %3133  ;;  %v1507_v26 = vpack.c.bf16 %v788_v52, %v788_v52 }
 0x67c   : > { %v1793_v30 = vmul.f32 %v3134_v16, %v4282_v63  ;;  %v3136_v31 = vpop.eup %3135  ;;  %2775 = vmatpush3.bf16.xpose.msra.mxu1 %v2161_v9  ;;  %v791_v63 = vadd.f32 %v4475_v22, %v715_v33 }
 0x67d   : > { %2776 = vmatprep.subr.bf16.mxu1 %v4465_v37  ;;  %v2144_v17 = vmul.f32 %v3136_v31, %v4276_v36  ;;  %v2236_v6 = vpop.permute.xlu0 %2235 }
 0x67e   : > { %v1808_v20 = vpack.c.bf16 %v1793_v30, %v1792_v61  ;;  %v1859_v47 = vpack.c.bf16 %v791_v63, %v791_v63 }
 0x67f   : > { %v3138_v14 = vpop.eup %3137 }
 0x680   : > { %v2145_v48 = vmul.f32 %v3138_v14, %v4285_v32  ;;  %2739 = vmatpush3.bf16.xpose.msra.mxu0 %v1808_v20 }
 0x682   : > { %v2160_v1 = vpack.c.bf16 %v2145_v48, %v2144_v17 }
 0x684   : > { %2777 = vmatpush3.bf16.xpose.msra.mxu1 %v2160_v1 }
 0x687   : > { %2741 = vmatmul.mubr.bf16.vlgmr.msra.gmra.mxu0 %v1507_v26 }
 0x688   : > { %2786 = vmatprep.mubr.msk.bf16.mxu0 %vm528_vm0, %v2881_v54 }
 0x68b   : > { %2779 = vmatmul.mubr.bf16.vlgmr.msra.gmra.mxu1 %v1859_v47 }
 0x747   : > { %v1850_v37 = vpop.f32.mrf.mxu0 }
 0x749   : > { %v2742_v36 = vpop.f32.mrf.mxu0 }
 0x74b   : > { %v1853_v40 = vpop.f32.mrf.mxu0  ;;  %v2202_v32 = vpop.f32.mrf.mxu1 }
 0x74c   : > { %v2214_v55 = vpack.c.bf16 %v2202_v32, %v1850_v37 }
 0x74d   : > { %v2743_v34 = vpop.f32.mrf.mxu0  ;;  %v2780_v51 = vpop.f32.mrf.mxu1 }
 0x74e   : > { %2782 = vmatprep.subr.bf16.mxu0 %v2214_v55 }
 0x74f   : > { %v2205_v59 = vpop.f32.mrf.mxu1  ;;  %2783 = vmatpush3.bf16.msra.mxu0 %v2214_v55 }
 0x750   : > { %2784 = vmatprep.subr.bf16.mxu0 %v3965_v46 }
 0x751   : > { %v2781_v42 = vpop.f32.mrf.mxu1 }
 0x753   : > { %2785 = vmatpush3.bf16.msra.mxu0 %v3965_v46 }
 0x756   : > { %2787 = vmatmul.mubr.msk.bf16.vlgmr.msra.gmra.mxu0 %vm528_vm0, %v2882_v12 }
 0x816   : > { %v2788_v60 = vpop.f32.mrf.mxu0 }
 0x817   : > { %v2302_v7 = vadd.f32 %v2788_v60, %v2236_v6 }
 0x818   : > { %v2293_v41 = vpop.f32.mrf.mxu0 }
 0x819   : > { %2310 = vst [vmem:[%s446_s14 + $0x10] sm:$0xff] %v2302_v7  ;;  %v2294_v21 = vadd.f32 %v2293_v41, %v2226_v39 }
 0x81a   : > { %v2789_v38 = vpop.f32.mrf.mxu0 }
 0x81b   : > { %2308 = vst [vmem:[%s446_s14] sm:$0xff] %v2294_v21  ;;  %v2305_v46 = vadd.f32 %v2789_v38, %v2241_v56 }
 0x81c   : > { %v2296_v24 = vpop.f32.mrf.mxu0 }
 0x81d   : > { %2311 = vst [vmem:[%s446_s14 + $0x18] sm:$0xff] %v2305_v46  ;;  %v2297_v44 = vadd.f32 %v2296_v24, %v2231_v25 }
 0x81f   : > { %2309 = vst [vmem:[%s446_s14 + $0x8] sm:$0xff] %v2297_v44 }
 0x820   : > { %3178 = shalt.err (!%p3175_p3)
}
 0x821   : > { %s3179_s26 = scalar_lea.hbm %s4365_s13, 512  ;;  %s3183_s12 = scalar_lea.hbm %s4423_s11, 1024 }
 0x822   : > { %p3180_p5 = scmp.ne.s32.totalorder %s4365_s13, %s3179_s26  ;;  %p3184_p9 = scmp.lt.s32.totalorder %s4365_s13, %s4423_s11 }
 0x823   : > { %p3185_p12 = scmp.lt.s32.totalorder %s3183_s12, %s3179_s26 }
 0x824   : > { %p3181_p6 = pnand %p3180_p5, %p3356_p4 }
 0x825   : > { %p3186_p10 = por %p3185_p12, %p3184_p9 }
 0x826   : > { %p3182_p7 = pneg %p3181_p6 }
 0x828   : > { %p3187_p11 = pnand %p3186_p10, %p3182_p7 }
 0x82a   : > { %3190 = shalt.err (!%p3187_p11)
}
 0x82b   : > { %s3254_s0 = smov 128   ;;  %s3255_s20 = smov 8  }
 0x82c   : > { %2798 = dma.vmem_to_hbm [thread:$0]  (%p3356_p4), %s4360_s15, 512, %s4365_s13, %s4367_s24, %s3254_s0, %s3254_s0, %s3255_s20  }
 0x82d PF: > { %p2810_p13 = scmp.ge.s32.totalorder %s3245_s22, 2  ;;  %s2342_s28 = sand.u32 1, %s3225_s17  }
 0x82e   : > { %s2343_s26 = scalar_lea.sflag [#allocation5], %s2342_s28 }
 0x82f   : > { %p2805_p0 = pnand %p2810_p13, %p3363_p8 }
 0x831   : > { %p2806_p1 = pneg %p2805_p0 }
 0x833   : > { %3220 = dma.done.wait (%p2806_p1), %s2343_s26, 512  }
 0x834   : > { %3222 = vsyncadd (%p2806_p1), %s2343_s26, 4294966784  ;;  %s25_s22 = sadd.s32 1, %s3245_s22   ;;  %s4476_s17 = smov %s3229_s18 }
 0x835   : > { %p22_p2 = scmp.ge.s32.totalorder %s25_s22, 4   ;;  %s4477_s18 = smov %s3233_s19 }
 0x836   : > { %s4478_s19 = smov %s3369_s30  ;;  %s4479_s20 = smov %s3241_s21 }
 0x837   : > { %s4480_s21 = smov %s4482_s25  ;;  %24 = sbr.rel (!%p22_p2) target bundleno = 8 (0x8), region = 110 }
 0x83c   :  { %2348 = vsyncpa [#allocation4], 1 }
 0x83d   :  { %2350 = vsyncpa [#allocation4 + $0x1], 1 }
 0x83e   :  { %2351 = vsyncpa [#allocation5], 1 }
 0x83f   :  { %2353 = vsyncpa [#allocation5 + $0x1], 1 }

</bundles_post_ra>
